<compile_context>
chip_gen: v6e
topology: v6e:2x2x1
jax: 0.10.0
libtpu: 0.0.40
codegen_flags: <defaults>
</compile_context>

<pallas_src>
import jax
import jax.numpy as jnp
from jax import lax
from jax.experimental import pallas as pl
from jax.experimental.pallas import tpu as pltpu


def _fire_kernel(x_ref, ws_ref, bs_ref, w1_ref, b1_ref, w3r_ref, b3_ref,
                 out_ref, ysq_ref, col_ref):
    # x_ref  : (1, H, W, Cin)      whole image (re-DMA'd only when batch idx changes)
    # ysq_ref: (TH+2, W+2, Csq)    zero-padded squeeze activation for this tile
    # col_ref: (TH, W, 9*Csq)      im2col slab for the 3x3 branch
    # out_ref: (1, TH, W, Ce1+Ce3) fused-concat output tile
    _, H, W, Cin = x_ref.shape
    TH = out_ref.shape[1]
    Csq = ws_ref.shape[1]
    Ce1 = w1_ref.shape[1]
    Ce3 = w3r_ref.shape[1]

    h = pl.program_id(1)
    n_h = pl.num_programs(1)
    row0 = h * TH
    if TH % 8 == 0:
        row0 = pl.multiple_of(row0, 8)

    def squeeze(x2d):  # (M, Cin) -> (M, Csq) f32 : 1x1 conv + bias + ReLU
        y = jnp.dot(x2d, ws_ref[...], preferred_element_type=jnp.float32)
        return jnp.maximum(y + bs_ref[...], 0.0)

    # ---- squeeze this tile (+ 1-row halo) into the zero-padded scratch ----
    zero_row = jnp.zeros((W + 2, Csq), dtype=ysq_ref.dtype)
    zero_col = jnp.zeros((TH + 2, Csq), dtype=ysq_ref.dtype)
    ysq_ref[0, :, :] = zero_row        # top halo (overwritten below if interior)
    ysq_ref[TH + 1, :, :] = zero_row   # bottom halo
    ysq_ref[:, 0, :] = zero_col        # left halo column
    ysq_ref[:, W + 1, :] = zero_col    # right halo column

    x_mid = x_ref[0, pl.ds(row0, TH), :, :].reshape(TH * W, Cin)
    ysq_ref[1:TH + 1, 1:W + 1, :] = (
        squeeze(x_mid).reshape(TH, W, Csq).astype(ysq_ref.dtype))

    @pl.when(h > 0)
    def _():  # top halo row = squeeze of input row row0-1
        x_top = x_ref[0, pl.ds(row0 - 1, 1), :, :].reshape(W, Cin)
        ysq_ref[0, 1:W + 1, :] = squeeze(x_top).astype(ysq_ref.dtype)

    @pl.when(h < n_h - 1)
    def _():  # bottom halo row = squeeze of input row row0+TH
        x_bot = x_ref[0, pl.ds(row0 + TH, 1), :, :].reshape(W, Cin)
        ysq_ref[TH + 1, 1:W + 1, :] = squeeze(x_bot).astype(ysq_ref.dtype)

    # ---- expand3x3: build the im2col slab once, then ONE fat-K matmul ----
    y_center = None
    for k, (dy, dx) in enumerate((dy, dx) for dy in range(3) for dx in range(3)):
        tap = ysq_ref[dy:dy + TH, dx:dx + W, :]            # (TH, W, Csq)
        col_ref[:, :, k * Csq:(k + 1) * Csq] = tap
        if (dy, dx) == (1, 1):
            y_center = tap                                  # un-padded squeeze tile

    patches = col_ref[...].reshape(TH * W, 9 * Csq)
    e3 = jnp.dot(patches, w3r_ref[...], preferred_element_type=jnp.float32)
    e3 = jnp.maximum(e3 + b3_ref[...], 0.0)

    # ---- expand1x1 (reuses the center tap already in registers) ----
    e1 = jnp.dot(y_center.reshape(TH * W, Csq), w1_ref[...],
                 preferred_element_type=jnp.float32)
    e1 = jnp.maximum(e1 + b1_ref[...], 0.0)

    # ---- fused channel concat.  The HBM writeback of this block is lane-dense
    # (last dim = Ce1+Ce3); only these two VMEM-side writes are masked. ----
    out_ref[0, :, :, :Ce1] = e1.reshape(TH, W, Ce1).astype(out_ref.dtype)
    out_ref[0, :, :, Ce1:] = e3.reshape(TH, W, Ce3).astype(out_ref.dtype)


def _pick_tile_h(H):
    for th in (128, 64, 32, 16, 8):
        if th <= H and H % th == 0:
            return th
    return H


def fire_forward_nhwc(x, params, tile_h=None):
    """Hot-path entry: x is NHWC, output is NHWC (channels = Ce1+Ce3).
    params = (ws, bs, w1, b1, w3r, b3) in kernel layout (see torch_params_to_kernel)."""
    ws, bs, w1, b1, w3r, b3 = params
    N, H, W, Cin = x.shape
    Csq, Ce1, Ce3 = ws.shape[1], w1.shape[1], w3r.shape[1]
    Cout = Ce1 + Ce3
    if tile_h is None:
        tile_h = _pick_tile_h(H)
    assert H % tile_h == 0, (H, tile_h)
    n_h = H // tile_h

    dt = x.dtype
    isz = jnp.dtype(dt).itemsize
    # Explicit VMEM budget (double-buffered blocks + weights + scratch) with 2x
    # headroom, capped so the same tiling also fits v7x's smaller VMEM.
    est = (2 * H * W * Cin * isz
           + 2 * tile_h * W * Cout * isz
           + 2 * (Cin * Csq + Csq * Ce1 + 9 * Csq * Ce3 + Csq + Ce1 + Ce3) * 4
           + (tile_h + 2) * (W + 2) * Csq * isz
           + tile_h * W * 9 * Csq * isz)
    vmem_limit = int(min(max(2 * est, 8 * 1024 * 1024), 48 * 1024 * 1024))

    def _full(a):
        nd = a.ndim
        return pl.BlockSpec(a.shape, lambda n, h, _nd=nd: (0,) * _nd)

    return pl.pallas_call(
        _fire_kernel,
        out_shape=jax.ShapeDtypeStruct((N, H, W, Cout), dt),
        grid=(N, n_h),
        in_specs=[
            # whole image resident in VMEM; block index only changes with n, so
            # it is DMA'd once per image and reused across all H tiles.
            pl.BlockSpec((1, H, W, Cin), lambda n, h: (n, 0, 0, 0)),
            _full(ws), _full(bs), _full(w1), _full(b1), _full(w3r), _full(b3),
        ],
        out_specs=pl.BlockSpec((1, tile_h, W, Cout), lambda n, h: (n, h, 0, 0)),
        scratch_shapes=[
            pltpu.VMEM((tile_h + 2, W + 2, Csq), dt),   # padded squeeze tile
            pltpu.VMEM((tile_h, W, 9 * Csq), dt),       # im2col slab
        ],
        compiler_params=pltpu.CompilerParams(
            dimension_semantics=("parallel", "parallel"),
            vmem_limit_bytes=vmem_limit),
    )(x, ws, bs, w1, b1, w3r, b3)


def fire_forward(x_nchw, params, tile_h=None):
    """PyTorch-parity wrapper (NCHW in/out).  In a full NHWC network keep
    activations NHWC end-to-end and call fire_forward_nhwc directly so these
    boundary transposes disappear from the hot path."""
    x = jnp.transpose(x_nchw, (0, 2, 3, 1))          # NCHW -> NHWC
    out = fire_forward_nhwc(x, params, tile_h=tile_h)
    return jnp.transpose(out, (0, 3, 1, 2))          # NHWC -> NCHW


def torch_params_to_kernel(ws_t, bs, w1_t, b1, w3_t, b3):
    """PyTorch Conv2d OIHW weights -> kernel matmul layouts."""
    Ce3, Csq = w3_t.shape[0], w3_t.shape[1]
    ws = ws_t[:, :, 0, 0].T                                        # (Cin, Csq)
    w1 = w1_t[:, :, 0, 0].T                                        # (Csq, Ce1)
    w3r = jnp.transpose(w3_t, (2, 3, 1, 0)).reshape(9 * Csq, Ce3)  # (ky,kx,ci) fat-K
    return (ws, bs[None, :], w1, b1[None, :], w3r, b3[None, :])


def fire_reference(x_nchw, torch_params):
    """Pure-JAX reference with PyTorch-layout weights (OIHW)."""
    ws_t, bs, w1_t, b1, w3_t, b3 = torch_params
    dn = ("NCHW", "OIHW", "NCHW")
    y = lax.conv_general_dilated(x_nchw, ws_t, (1, 1), "VALID", dimension_numbers=dn)
    y = jax.nn.relu(y + bs[None, :, None, None])
    e1 = lax.conv_general_dilated(y, w1_t, (1, 1), "VALID", dimension_numbers=dn)
    e1 = jax.nn.relu(e1 + b1[None, :, None, None])
    e3 = lax.conv_general_dilated(y, w3_t, (1, 1), ((1, 1), (1, 1)),
                                  dimension_numbers=dn)
    e3 = jax.nn.relu(e3 + b3[None, :, None, None])
    return jnp.concatenate([e1, e3], axis=1)


if __name__ == "__main__":
    # Fire(inplanes=4, squeeze_planes=2, expand1x1_planes=4, expand3x3_planes=4)
    N, Cin, H, W = 2, 4, 16, 16
    Csq, Ce1, Ce3 = 2, 4, 4

    key = jax.random.PRNGKey(0)
    kx, k1, k2, k3, k4, k5, k6 = jax.random.split(key, 7)

    x = jax.random.normal(kx, (N, Cin, H, W), jnp.float32)

    # Deterministic synthetic parameters (PyTorch Conv2d OIHW layout).
    ws_t = jax.random.normal(k1, (Csq, Cin, 1, 1), jnp.float32) * 0.2
    bs_v = jax.random.normal(k2, (Csq,), jnp.float32) * 0.1
    w1_t = jax.random.normal(k3, (Ce1, Csq, 1, 1), jnp.float32) * 0.2
    b1_v = jax.random.normal(k4, (Ce1,), jnp.float32) * 0.1
    w3_t = jax.random.normal(k5, (Ce3, Csq, 3, 3), jnp.float32) * 0.2
    b3_v = jax.random.normal(k6, (Ce3,), jnp.float32) * 0.1

    params = torch_params_to_kernel(ws_t, bs_v, w1_t, b1_v, w3_t, b3_v)

    # tile_h=8 -> grid (2, 2): exercises the halo path and gives >1 pipeline
    # step per image even at this toy size.
    out = fire_forward(x, params, tile_h=8)
    out = jax.block_until_ready(out)

    ref = fire_reference(x, (ws_t, bs_v, w1_t, b1_v, w3_t, b3_v))
    assert out.shape == (N, Ce1 + Ce3, H, W), out.shape
    err = float(jnp.abs(out - ref).max())
    assert jnp.allclose(out, ref, atol=1e-4, rtol=1e-4), err

    print("KERNEL_OK")
</pallas_src>

<mosaic_0001>
module attributes {stable_mosaic.version = 11 : i64} {
  func.func @_fire_kernel(%arg0: i32, %arg1: i32, %arg2: memref<1x16x16x4xf32, #tpu.memory_space<vmem>>, %arg3: memref<4x2xf32, #tpu.memory_space<vmem>>, %arg4: memref<1x2xf32, #tpu.memory_space<vmem>>, %arg5: memref<2x4xf32, #tpu.memory_space<vmem>>, %arg6: memref<1x4xf32, #tpu.memory_space<vmem>>, %arg7: memref<18x4xf32, #tpu.memory_space<vmem>>, %arg8: memref<1x4xf32, #tpu.memory_space<vmem>>, %arg9: memref<1x8x16x8xf32, #tpu.memory_space<vmem>>, %arg10: memref<10x18x2xf32, #tpu.memory_space<vmem>>, %arg11: memref<8x16x18xf32, #tpu.memory_space<vmem>>) attributes {dimension_semantics = [#tpu.dimension_semantics<parallel>, #tpu.dimension_semantics<parallel>], iteration_bounds = array<i64: 2, 2>, scalar_prefetch = 0 : i64, scratch_operands = 2 : i64, tpu.core_type = #tpu.core_type<tc>, window_params = [{transform_indices = @transform_0, window_bounds = array<i64: 1, 16, 16, 4>}, {pipeline_mode = #tpu.pipeline_mode<synchronous>, transform_indices = @transform_1, window_bounds = array<i64: 4, 2>}, {pipeline_mode = #tpu.pipeline_mode<synchronous>, transform_indices = @transform_2, window_bounds = array<i64: 1, 2>}, {pipeline_mode = #tpu.pipeline_mode<synchronous>, transform_indices = @transform_3, window_bounds = array<i64: 2, 4>}, {pipeline_mode = #tpu.pipeline_mode<synchronous>, transform_indices = @transform_4, window_bounds = array<i64: 1, 4>}, {pipeline_mode = #tpu.pipeline_mode<synchronous>, transform_indices = @transform_5, window_bounds = array<i64: 18, 4>}, {pipeline_mode = #tpu.pipeline_mode<synchronous>, transform_indices = @transform_6, window_bounds = array<i64: 1, 4>}, {transform_indices = @transform_7, window_bounds = array<i64: 1, 8, 16, 8>}]} {
    %c8_i32 = arith.constant 8 : i32
    %0 = arith.muli %arg1, %c8_i32 : i32
    %1 = tpu.assume_multiple %0, 8 : i32
    %cst = arith.constant 0.000000e+00 : f32
    %2 = vector.broadcast %cst : f32 to vector<18x2xf32>
    %cst_0 = arith.constant 0.000000e+00 : f32
    %3 = vector.broadcast %cst_0 : f32 to vector<10x2xf32>
    %c0 = arith.constant 0 : index
    %c0_1 = arith.constant 0 : index
    %c0_2 = arith.constant 0 : index
    %4 = vector.load %arg10[%c0, %c0_1, %c0_2] : memref<10x18x2xf32, #tpu.memory_space<vmem>>, vector<1x18x2xf32>
    %5 = vector.shape_cast %4 : vector<1x18x2xf32> to vector<18x2xf32>
    %6 = vector.shape_cast %2 : vector<18x2xf32> to vector<1x18x2xf32>
    tpu.vector_store %arg10[%c0, %c0_1, %c0_2], %6 {strides = array<i32>} : memref<10x18x2xf32, #tpu.memory_space<vmem>>, vector<1x18x2xf32>,
    %c9 = arith.constant 9 : index
    %c0_3 = arith.constant 0 : index
    %c0_4 = arith.constant 0 : index
    %7 = vector.load %arg10[%c9, %c0_3, %c0_4] : memref<10x18x2xf32, #tpu.memory_space<vmem>>, vector<1x18x2xf32>
    %8 = vector.shape_cast %7 : vector<1x18x2xf32> to vector<18x2xf32>
    %9 = vector.shape_cast %2 : vector<18x2xf32> to vector<1x18x2xf32>
    tpu.vector_store %arg10[%c9, %c0_3, %c0_4], %9 {strides = array<i32>} : memref<10x18x2xf32, #tpu.memory_space<vmem>>, vector<1x18x2xf32>,
    %c0_5 = arith.constant 0 : index
    %c0_6 = arith.constant 0 : index
    %c0_7 = arith.constant 0 : index
    %10 = vector.load %arg10[%c0_5, %c0_6, %c0_7] : memref<10x18x2xf32, #tpu.memory_space<vmem>>, vector<10x1x2xf32>
    %11 = vector.shape_cast %10 : vector<10x1x2xf32> to vector<10x2xf32>
    %12 = vector.shape_cast %3 : vector<10x2xf32> to vector<10x1x2xf32>
    tpu.vector_store %arg10[%c0_5, %c0_6, %c0_7], %12 {strides = array<i32>} : memref<10x18x2xf32, #tpu.memory_space<vmem>>, vector<10x1x2xf32>,
    %c0_8 = arith.constant 0 : index
    %c17 = arith.constant 17 : index
    %c0_9 = arith.constant 0 : index
    %13 = vector.load %arg10[%c0_8, %c17, %c0_9] : memref<10x18x2xf32, #tpu.memory_space<vmem>>, vector<10x1x2xf32>
    %14 = vector.shape_cast %13 : vector<10x1x2xf32> to vector<10x2xf32>
    %15 = vector.shape_cast %3 : vector<10x2xf32> to vector<10x1x2xf32>
    tpu.vector_store %arg10[%c0_8, %c17, %c0_9], %15 {strides = array<i32>} : memref<10x18x2xf32, #tpu.memory_space<vmem>>, vector<10x1x2xf32>,
    %c0_10 = arith.constant 0 : index
    %16 = arith.index_cast %1 : i32 to index
    %c0_11 = arith.constant 0 : index
    %c0_12 = arith.constant 0 : index
    %17 = vector.load %arg2[%c0_10, %16, %c0_11, %c0_12] : memref<1x16x16x4xf32, #tpu.memory_space<vmem>>, vector<1x8x16x4xf32>
    %18 = vector.shape_cast %17 : vector<1x8x16x4xf32> to vector<8x16x4xf32>
    %19 = vector.shape_cast %18 : vector<8x16x4xf32> to vector<128x4xf32>
    %c0_13 = arith.constant 0 : index
    %c0_14 = arith.constant 0 : index
    %20 = vector.load %arg3[%c0_13, %c0_14] : memref<4x2xf32, #tpu.memory_space<vmem>>, vector<4x2xf32>
    %cst_15 = arith.constant dense<0.000000e+00> : vector<128x2xf32>
    %21 = tpu.matmul %19, %20, %cst_15 {dimension_numbers = #tpu.dot_dimension_numbers<[1], [0], [0], [1], [0, 0, 1, 1], [], []>} : vector<128x4xf32>, vector<4x2xf32>, vector<128x2xf32> -> vector<128x2xf32>
    %c0_16 = arith.constant 0 : index
    %c0_17 = arith.constant 0 : index
    %22 = vector.load %arg4[%c0_16, %c0_17] : memref<1x2xf32, #tpu.memory_space<vmem>>, vector<1x2xf32>
    %23 = vector.broadcast %22 : vector<1x2xf32> to vector<128x2xf32>
    %24 = arith.addf %21, %23 : vector<128x2xf32>
    %cst_18 = arith.constant 0.000000e+00 : f32
    %25 = vector.broadcast %cst_18 : f32 to vector<128x2xf32>
    %26 = arith.maximumf %24, %25 : vector<128x2xf32>
    %27 = vector.shape_cast %26 : vector<128x2xf32> to vector<8x16x2xf32>
    %c1 = arith.constant 1 : index
    %c1_19 = arith.constant 1 : index
    %c0_20 = arith.constant 0 : index
    %28 = vector.load %arg10[%c1, %c1_19, %c0_20] : memref<10x18x2xf32, #tpu.memory_space<vmem>>, vector<8x16x2xf32>
    tpu.vector_store %arg10[%c1, %c1_19, %c0_20], %27 {strides = array<i32>} : memref<10x18x2xf32, #tpu.memory_space<vmem>>, vector<8x16x2xf32>,
    %c0_i32 = arith.constant 0 : i32
    %29 = arith.cmpi sgt, %arg1, %c0_i32 : i32
    %30 = arith.extui %29 : i1 to i32
    %c0_i32_21 = arith.constant 0 : i32
    %31 = arith.cmpi ne, %30, %c0_i32_21 : i32
    scf.if %31 {
      %c1_i32_92 = arith.constant 1 : i32
      %78 = arith.subi %1, %c1_i32_92 : i32
      %c0_93 = arith.constant 0 : index
      %79 = arith.index_cast %78 : i32 to index
      %c0_94 = arith.constant 0 : index
      %c0_95 = arith.constant 0 : index
      %80 = vector.load %arg2[%c0_93, %79, %c0_94, %c0_95] : memref<1x16x16x4xf32, #tpu.memory_space<vmem>>, vector<1x1x16x4xf32>
      %81 = vector.shape_cast %80 : vector<1x1x16x4xf32> to vector<1x16x4xf32>
      %82 = vector.shape_cast %81 : vector<1x16x4xf32> to vector<16x4xf32>
      %c0_96 = arith.constant 0 : index
      %c0_97 = arith.constant 0 : index
      %83 = vector.load %arg3[%c0_96, %c0_97] : memref<4x2xf32, #tpu.memory_space<vmem>>, vector<4x2xf32>
      %cst_98 = arith.constant dense<0.000000e+00> : vector<16x2xf32>
      %84 = tpu.matmul %82, %83, %cst_98 {dimension_numbers = #tpu.dot_dimension_numbers<[1], [0], [0], [1], [0, 0, 1, 1], [], []>} : vector<16x4xf32>, vector<4x2xf32>, vector<16x2xf32> -> vector<16x2xf32>
      %c0_99 = arith.constant 0 : index
      %c0_100 = arith.constant 0 : index
      %85 = vector.load %arg4[%c0_99, %c0_100] : memref<1x2xf32, #tpu.memory_space<vmem>>, vector<1x2xf32>
      %86 = vector.broadcast %85 : vector<1x2xf32> to vector<16x2xf32>
      %87 = arith.addf %84, %86 : vector<16x2xf32>
      %cst_101 = arith.constant 0.000000e+00 : f32
      %88 = vector.broadcast %cst_101 : f32 to vector<16x2xf32>
      %89 = arith.maximumf %87, %88 : vector<16x2xf32>
      %c0_102 = arith.constant 0 : index
      %c1_103 = arith.constant 1 : index
      %c0_104 = arith.constant 0 : index
      %90 = vector.load %arg10[%c0_102, %c1_103, %c0_104] : memref<10x18x2xf32, #tpu.memory_space<vmem>>, vector<1x16x2xf32>
      %91 = vector.shape_cast %90 : vector<1x16x2xf32> to vector<16x2xf32>
      %92 = vector.shape_cast %89 : vector<16x2xf32> to vector<1x16x2xf32>
      tpu.vector_store %arg10[%c0_102, %c1_103, %c0_104], %92 {strides = array<i32>} : memref<10x18x2xf32, #tpu.memory_space<vmem>>, vector<1x16x2xf32>,
    } else {
    }
    %c1_i32 = arith.constant 1 : i32
    %32 = arith.cmpi slt, %arg1, %c1_i32 : i32
    %33 = arith.extui %32 : i1 to i32
    %c0_i32_22 = arith.constant 0 : i32
    %34 = arith.cmpi ne, %33, %c0_i32_22 : i32
    scf.if %34 {
      %c8_i32_92 = arith.constant 8 : i32
      %78 = arith.addi %1, %c8_i32_92 : i32
      %c0_93 = arith.constant 0 : index
      %79 = arith.index_cast %78 : i32 to index
      %c0_94 = arith.constant 0 : index
      %c0_95 = arith.constant 0 : index
      %80 = vector.load %arg2[%c0_93, %79, %c0_94, %c0_95] : memref<1x16x16x4xf32, #tpu.memory_space<vmem>>, vector<1x1x16x4xf32>
      %81 = vector.shape_cast %80 : vector<1x1x16x4xf32> to vector<1x16x4xf32>
      %82 = vector.shape_cast %81 : vector<1x16x4xf32> to vector<16x4xf32>
      %c0_96 = arith.constant 0 : index
      %c0_97 = arith.constant 0 : index
      %83 = vector.load %arg3[%c0_96, %c0_97] : memref<4x2xf32, #tpu.memory_space<vmem>>, vector<4x2xf32>
      %cst_98 = arith.constant dense<0.000000e+00> : vector<16x2xf32>
      %84 = tpu.matmul %82, %83, %cst_98 {dimension_numbers = #tpu.dot_dimension_numbers<[1], [0], [0], [1], [0, 0, 1, 1], [], []>} : vector<16x4xf32>, vector<4x2xf32>, vector<16x2xf32> -> vector<16x2xf32>
      %c0_99 = arith.constant 0 : index
      %c0_100 = arith.constant 0 : index
      %85 = vector.load %arg4[%c0_99, %c0_100] : memref<1x2xf32, #tpu.memory_space<vmem>>, vector<1x2xf32>
      %86 = vector.broadcast %85 : vector<1x2xf32> to vector<16x2xf32>
      %87 = arith.addf %84, %86 : vector<16x2xf32>
      %cst_101 = arith.constant 0.000000e+00 : f32
      %88 = vector.broadcast %cst_101 : f32 to vector<16x2xf32>
      %89 = arith.maximumf %87, %88 : vector<16x2xf32>
      %c9_102 = arith.constant 9 : index
      %c1_103 = arith.constant 1 : index
      %c0_104 = arith.constant 0 : index
      %90 = vector.load %arg10[%c9_102, %c1_103, %c0_104] : memref<10x18x2xf32, #tpu.memory_space<vmem>>, vector<1x16x2xf32>
      %91 = vector.shape_cast %90 : vector<1x16x2xf32> to vector<16x2xf32>
      %92 = vector.shape_cast %89 : vector<16x2xf32> to vector<1x16x2xf32>
      tpu.vector_store %arg10[%c9_102, %c1_103, %c0_104], %92 {strides = array<i32>} : memref<10x18x2xf32, #tpu.memory_space<vmem>>, vector<1x16x2xf32>,
    } else {
    }
    %c0_23 = arith.constant 0 : index
    %c0_24 = arith.constant 0 : index
    %c0_25 = arith.constant 0 : index
    %35 = vector.load %arg10[%c0_23, %c0_24, %c0_25] : memref<10x18x2xf32, #tpu.memory_space<vmem>>, vector<8x16x2xf32>
    %c0_26 = arith.constant 0 : index
    %c0_27 = arith.constant 0 : index
    %c0_28 = arith.constant 0 : index
    %36 = vector.load %arg11[%c0_26, %c0_27, %c0_28] : memref<8x16x18xf32, #tpu.memory_space<vmem>>, vector<8x16x2xf32>
    tpu.vector_store %arg11[%c0_26, %c0_27, %c0_28], %35 {strides = array<i32>} : memref<8x16x18xf32, #tpu.memory_space<vmem>>, vector<8x16x2xf32>,
    %c0_29 = arith.constant 0 : index
    %c1_30 = arith.constant 1 : index
    %c0_31 = arith.constant 0 : index
    %37 = vector.load %arg10[%c0_29, %c1_30, %c0_31] : memref<10x18x2xf32, #tpu.memory_space<vmem>>, vector<8x16x2xf32>
    %c0_32 = arith.constant 0 : index
    %c0_33 = arith.constant 0 : index
    %c2 = arith.constant 2 : index
    %38 = vector.load %arg11[%c0_32, %c0_33, %c2] : memref<8x16x18xf32, #tpu.memory_space<vmem>>, vector<8x16x2xf32>
    tpu.vector_store %arg11[%c0_32, %c0_33, %c2], %37 {strides = array<i32>} : memref<8x16x18xf32, #tpu.memory_space<vmem>>, vector<8x16x2xf32>,
    %c0_34 = arith.constant 0 : index
    %c2_35 = arith.constant 2 : index
    %c0_36 = arith.constant 0 : index
    %39 = vector.load %arg10[%c0_34, %c2_35, %c0_36] : memref<10x18x2xf32, #tpu.memory_space<vmem>>, vector<8x16x2xf32>
    %c0_37 = arith.constant 0 : index
    %c0_38 = arith.constant 0 : index
    %c4 = arith.constant 4 : index
    %40 = vector.load %arg11[%c0_37, %c0_38, %c4] : memref<8x16x18xf32, #tpu.memory_space<vmem>>, vector<8x16x2xf32>
    tpu.vector_store %arg11[%c0_37, %c0_38, %c4], %39 {strides = array<i32>} : memref<8x16x18xf32, #tpu.memory_space<vmem>>, vector<8x16x2xf32>,
    %c1_39 = arith.constant 1 : index
    %c0_40 = arith.constant 0 : index
    %c0_41 = arith.constant 0 : index
    %41 = vector.load %arg10[%c1_39, %c0_40, %c0_41] : memref<10x18x2xf32, #tpu.memory_space<vmem>>, vector<8x16x2xf32>
    %c0_42 = arith.constant 0 : index
    %c0_43 = arith.constant 0 : index
    %c6 = arith.constant 6 : index
    %42 = vector.load %arg11[%c0_42, %c0_43, %c6] : memref<8x16x18xf32, #tpu.memory_space<vmem>>, vector<8x16x2xf32>
    tpu.vector_store %arg11[%c0_42, %c0_43, %c6], %41 {strides = array<i32>} : memref<8x16x18xf32, #tpu.memory_space<vmem>>, vector<8x16x2xf32>,
    %c1_44 = arith.constant 1 : index
    %c1_45 = arith.constant 1 : index
    %c0_46 = arith.constant 0 : index
    %43 = vector.load %arg10[%c1_44, %c1_45, %c0_46] : memref<10x18x2xf32, #tpu.memory_space<vmem>>, vector<8x16x2xf32>
    %c0_47 = arith.constant 0 : index
    %c0_48 = arith.constant 0 : index
    %c8 = arith.constant 8 : index
    %44 = vector.load %arg11[%c0_47, %c0_48, %c8] : memref<8x16x18xf32, #tpu.memory_space<vmem>>, vector<8x16x2xf32>
    tpu.vector_store %arg11[%c0_47, %c0_48, %c8], %43 {strides = array<i32>} : memref<8x16x18xf32, #tpu.memory_space<vmem>>, vector<8x16x2xf32>,
    %c1_49 = arith.constant 1 : index
    %c2_50 = arith.constant 2 : index
    %c0_51 = arith.constant 0 : index
    %45 = vector.load %arg10[%c1_49, %c2_50, %c0_51] : memref<10x18x2xf32, #tpu.memory_space<vmem>>, vector<8x16x2xf32>
    %c0_52 = arith.constant 0 : index
    %c0_53 = arith.constant 0 : index
    %c10 = arith.constant 10 : index
    %46 = vector.load %arg11[%c0_52, %c0_53, %c10] : memref<8x16x18xf32, #tpu.memory_space<vmem>>, vector<8x16x2xf32>
    tpu.vector_store %arg11[%c0_52, %c0_53, %c10], %45 {strides = array<i32>} : memref<8x16x18xf32, #tpu.memory_space<vmem>>, vector<8x16x2xf32>,
    %c2_54 = arith.constant 2 : index
    %c0_55 = arith.constant 0 : index
    %c0_56 = arith.constant 0 : index
    %47 = vector.load %arg10[%c2_54, %c0_55, %c0_56] : memref<10x18x2xf32, #tpu.memory_space<vmem>>, vector<8x16x2xf32>
    %c0_57 = arith.constant 0 : index
    %c0_58 = arith.constant 0 : index
    %c12 = arith.constant 12 : index
    %48 = vector.load %arg11[%c0_57, %c0_58, %c12] : memref<8x16x18xf32, #tpu.memory_space<vmem>>, vector<8x16x2xf32>
    tpu.vector_store %arg11[%c0_57, %c0_58, %c12], %47 {strides = array<i32>} : memref<8x16x18xf32, #tpu.memory_space<vmem>>, vector<8x16x2xf32>,
    %c2_59 = arith.constant 2 : index
    %c1_60 = arith.constant 1 : index
    %c0_61 = arith.constant 0 : index
    %49 = vector.load %arg10[%c2_59, %c1_60, %c0_61] : memref<10x18x2xf32, #tpu.memory_space<vmem>>, vector<8x16x2xf32>
    %c0_62 = arith.constant 0 : index
    %c0_63 = arith.constant 0 : index
    %c14 = arith.constant 14 : index
    %50 = vector.load %arg11[%c0_62, %c0_63, %c14] : memref<8x16x18xf32, #tpu.memory_space<vmem>>, vector<8x16x2xf32>
    tpu.vector_store %arg11[%c0_62, %c0_63, %c14], %49 {strides = array<i32>} : memref<8x16x18xf32, #tpu.memory_space<vmem>>, vector<8x16x2xf32>,
    %c2_64 = arith.constant 2 : index
    %c2_65 = arith.constant 2 : index
    %c0_66 = arith.constant 0 : index
    %51 = vector.load %arg10[%c2_64, %c2_65, %c0_66] : memref<10x18x2xf32, #tpu.memory_space<vmem>>, vector<8x16x2xf32>
    %c0_67 = arith.constant 0 : index
    %c0_68 = arith.constant 0 : index
    %c16 = arith.constant 16 : index
    %52 = vector.load %arg11[%c0_67, %c0_68, %c16] : memref<8x16x18xf32, #tpu.memory_space<vmem>>, vector<8x16x2xf32>
    tpu.vector_store %arg11[%c0_67, %c0_68, %c16], %51 {strides = array<i32>} : memref<8x16x18xf32, #tpu.memory_space<vmem>>, vector<8x16x2xf32>,
    %c0_69 = arith.constant 0 : index
    %c0_70 = arith.constant 0 : index
    %c0_71 = arith.constant 0 : index
    %53 = vector.load %arg11[%c0_69, %c0_70, %c0_71] : memref<8x16x18xf32, #tpu.memory_space<vmem>>, vector<8x16x18xf32>
    %54 = vector.shape_cast %53 : vector<8x16x18xf32> to vector<128x18xf32>
    %c0_72 = arith.constant 0 : index
    %c0_73 = arith.constant 0 : index
    %55 = vector.load %arg7[%c0_72, %c0_73] : memref<18x4xf32, #tpu.memory_space<vmem>>, vector<18x4xf32>
    %cst_74 = arith.constant dense<0.000000e+00> : vector<128x4xf32>
    %56 = tpu.matmul %54, %55, %cst_74 {dimension_numbers = #tpu.dot_dimension_numbers<[1], [0], [0], [1], [0, 0, 1, 1], [], []>} : vector<128x18xf32>, vector<18x4xf32>, vector<128x4xf32> -> vector<128x4xf32>
    %c0_75 = arith.constant 0 : index
    %c0_76 = arith.constant 0 : index
    %57 = vector.load %arg8[%c0_75, %c0_76] : memref<1x4xf32, #tpu.memory_space<vmem>>, vector<1x4xf32>
    %58 = vector.broadcast %57 : vector<1x4xf32> to vector<128x4xf32>
    %59 = arith.addf %56, %58 : vector<128x4xf32>
    %cst_77 = arith.constant 0.000000e+00 : f32
    %60 = vector.broadcast %cst_77 : f32 to vector<128x4xf32>
    %61 = arith.maximumf %59, %60 : vector<128x4xf32>
    %62 = vector.shape_cast %43 : vector<8x16x2xf32> to vector<128x2xf32>
    %c0_78 = arith.constant 0 : index
    %c0_79 = arith.constant 0 : index
    %63 = vector.load %arg5[%c0_78, %c0_79] : memref<2x4xf32, #tpu.memory_space<vmem>>, vector<2x4xf32>
    %cst_80 = arith.constant dense<0.000000e+00> : vector<128x4xf32>
    %64 = tpu.matmul %62, %63, %cst_80 {dimension_numbers = #tpu.dot_dimension_numbers<[1], [0], [0], [1], [0, 0, 1, 1], [], []>} : vector<128x2xf32>, vector<2x4xf32>, vector<128x4xf32> -> vector<128x4xf32>
    %c0_81 = arith.constant 0 : index
    %c0_82 = arith.constant 0 : index
    %65 = vector.load %arg6[%c0_81, %c0_82] : memref<1x4xf32, #tpu.memory_space<vmem>>, vector<1x4xf32>
    %66 = vector.broadcast %65 : vector<1x4xf32> to vector<128x4xf32>
    %67 = arith.addf %64, %66 : vector<128x4xf32>
    %cst_83 = arith.constant 0.000000e+00 : f32
    %68 = vector.broadcast %cst_83 : f32 to vector<128x4xf32>
    %69 = arith.maximumf %67, %68 : vector<128x4xf32>
    %70 = vector.shape_cast %69 : vector<128x4xf32> to vector<8x16x4xf32>
    %c0_84 = arith.constant 0 : index
    %c0_85 = arith.constant 0 : index
    %c0_86 = arith.constant 0 : index
    %c0_87 = arith.constant 0 : index
    %71 = vector.load %arg9[%c0_84, %c0_85, %c0_86, %c0_87] : memref<1x8x16x8xf32, #tpu.memory_space<vmem>>, vector<1x8x16x4xf32>
    %72 = vector.shape_cast %71 : vector<1x8x16x4xf32> to vector<8x16x4xf32>
    %73 = vector.shape_cast %70 : vector<8x16x4xf32> to vector<1x8x16x4xf32>
    tpu.vector_store %arg9[%c0_84, %c0_85, %c0_86, %c0_87], %73 {strides = array<i32>} : memref<1x8x16x8xf32, #tpu.memory_space<vmem>>, vector<1x8x16x4xf32>,
    %74 = vector.shape_cast %61 : vector<128x4xf32> to vector<8x16x4xf32>
    %c0_88 = arith.constant 0 : index
    %c0_89 = arith.constant 0 : index
    %c0_90 = arith.constant 0 : index
    %c4_91 = arith.constant 4 : index
    %75 = vector.load %arg9[%c0_88, %c0_89, %c0_90, %c4_91] : memref<1x8x16x8xf32, #tpu.memory_space<vmem>>, vector<1x8x16x4xf32>
    %76 = vector.shape_cast %75 : vector<1x8x16x4xf32> to vector<8x16x4xf32>
    %77 = vector.shape_cast %74 : vector<8x16x4xf32> to vector<1x8x16x4xf32>
    tpu.vector_store %arg9[%c0_88, %c0_89, %c0_90, %c4_91], %77 {strides = array<i32>} : memref<1x8x16x8xf32, #tpu.memory_space<vmem>>, vector<1x8x16x4xf32>,
    return
  }
  func.func @transform_0(%arg0: i32, %arg1: i32) -> (i32, i32, i32, i32) {
    %c0_i32 = arith.constant 0 : i32
    %c0_i32_0 = arith.constant 0 : i32
    %c0_i32_1 = arith.constant 0 : i32
    %c0_i32_2 = arith.constant 0 : i32
    return %arg0, %c0_i32, %c0_i32_0, %c0_i32_1 : i32, i32, i32, i32
  }
  func.func @transform_1(%arg0: i32, %arg1: i32) -> (i32, i32) {
    %c0_i32 = arith.constant 0 : i32
    %c0_i32_0 = arith.constant 0 : i32
    %c0_i32_1 = arith.constant 0 : i32
    return %c0_i32, %c0_i32_0 : i32, i32
  }
  func.func @transform_2(%arg0: i32, %arg1: i32) -> (i32, i32) {
    %c0_i32 = arith.constant 0 : i32
    %c0_i32_0 = arith.constant 0 : i32
    %c0_i32_1 = arith.constant 0 : i32
    return %c0_i32, %c0_i32_0 : i32, i32
  }
  func.func @transform_3(%arg0: i32, %arg1: i32) -> (i32, i32) {
    %c0_i32 = arith.constant 0 : i32
    %c0_i32_0 = arith.constant 0 : i32
    %c0_i32_1 = arith.constant 0 : i32
    return %c0_i32, %c0_i32_0 : i32, i32
  }
  func.func @transform_4(%arg0: i32, %arg1: i32) -> (i32, i32) {
    %c0_i32 = arith.constant 0 : i32
    %c0_i32_0 = arith.constant 0 : i32
    %c0_i32_1 = arith.constant 0 : i32
    return %c0_i32, %c0_i32_0 : i32, i32
  }
  func.func @transform_5(%arg0: i32, %arg1: i32) -> (i32, i32) {
    %c0_i32 = arith.constant 0 : i32
    %c0_i32_0 = arith.constant 0 : i32
    %c0_i32_1 = arith.constant 0 : i32
    return %c0_i32, %c0_i32_0 : i32, i32
  }
  func.func @transform_6(%arg0: i32, %arg1: i32) -> (i32, i32) {
    %c0_i32 = arith.constant 0 : i32
    %c0_i32_0 = arith.constant 0 : i32
    %c0_i32_1 = arith.constant 0 : i32
    return %c0_i32, %c0_i32_0 : i32, i32
  }
  func.func @transform_7(%arg0: i32, %arg1: i32) -> (i32, i32, i32, i32) {
    %c0_i32 = arith.constant 0 : i32
    %c0_i32_0 = arith.constant 0 : i32
    %c0_i32_1 = arith.constant 0 : i32
    return %arg0, %arg1, %c0_i32, %c0_i32_0 : i32, i32, i32, i32
  }
}

</mosaic_0001>

<bundles_post_ra>
// kernel: tpu_custom_call.1
= control target key start
LH: loop header
LB: loop body
LE: loop exit
PB: predicated region body
PF: predicated region fallthrough
CT: control target
= control target key end

     0   :  { %s2629_s24 = smov 0   ;;  %s2631_s25 = smov 0   ;;  %s3370_s0 = inlined_call_operand.vmem [shape: f32[2,16,16,4], index: 0, kind: input, shape index: {}]   ;;  %s3371_s1 = inlined_call_operand.vmem [shape: f32[4,2], index: 1, kind: input, shape index: {}]   ;;  %s3372_s2 = inlined_call_operand.vmem [shape: f32[1,2], index: 2, kind: input, shape index: {}]   ;;  %s3373_s3 = inlined_call_operand.vmem [shape: f32[2,4], index: 3, kind: input, shape index: {}]   ;;  %s3374_s4 = inlined_call_operand.vmem [shape: f32[1,4], index: 4, kind: input, shape index: {}]   ;;  %s3375_s5 = inlined_call_operand.vmem [shape: f32[18,4], index: 5, kind: input, shape index: {}]   ;;  %s3376_s6 = inlined_call_operand.vmem [shape: f32[1,4], index: 6, kind: input, shape index: {}]   ;;  %s3377_s7 = inlined_call_operand.vmem [shape: f32[2,16,16,8], index: 7, kind: output, shape index: {}]  }
   0x1   :  { %s2633_s26 = smov 0   ;;  %s2635_s27 = smov 0  }
   0x2   :  { %s2637_s28 = smov 0  }
   0x3 LB: > { %s26_s29 = sadd.s32 1, %s2570_s26  ;;  %s29_s30 = sadd.s32 1, %s2574_s27  ;;  %s2578_s28 = sphi %s2637_s28, %s17_s28   ;;  %s2574_s27 = sphi %s2635_s27, %s3381_s27   ;;  %s2570_s26 = sphi %s2633_s26, %s3380_s26   ;;  %s2566_s25 = sphi %s2631_s25, %s3379_s25   ;;  %s2562_s24 = sphi %s2629_s24, %s3378_s24  }
   0x4   : > { %p27_p0 = scmp.ge.s32.totalorder %s26_s29, 2  ;;  %p2254_p1 = scmp.ge.s32.totalorder %s2578_s28, 1 }
   0x5   : > { %p251_p2 = scmp.lt.s32.totalorder %s2578_s28, 5 }
   0x6   : > { %s3383_s29 = smov (%p27_p0, %s26_s29), 0  ;;  %s3385_s30 = smov (!%p27_p0, %s29_s30), %s2574_s27 }
   0x7   : > { %p252_p3 = pnand %p2254_p1, %p251_p2  ;;  %p31_p4 = scmp.ge.s32.totalorder %s3385_s30, 2 }
   0x8   : > { %p288_p5 = scmp.lt.s32.totalorder (!%p252_p3), %s2566_s25, 1  ;;  %s2665_s10 = sshll.u32 (!%p252_p3), %s2562_s24, 3 }
   0x9   : > { %s3387_s30 = smov (%p31_p4, %s3385_s30), 0  ;;  %255 = sbr.rel (%p252_p3) target bundleno = 1341 (0x53d), region = 48 }
   0xa   : > { %p296_p6 = scmp.lt.s32.totalorder (!%p252_p3), %s2665_s10, 15  ;;  %s2336_s11 = sshll.u32 (!%p252_p3), %s2562_s24, 7 }
   0xb   : > { %p2281_p7 = scmp.le.s32.totalorder (!%p252_p3), %s2562_s24, 0 }
   0xe   : > { %v353_v0 = vld [vmem:[%s3371_s1] sm:$0xf]  ;;  %vm410_vm0 = vcmask 1043456   ;;  %vm305_vm1 = vcmask 15360   ;;  %vm308_vm2 = vcmask 9216   ;;  %vm314_vm3 = vcmask 8192  }
   0xf   : > { %2397 = vmatprep.subr.msk.mxu0 %vm410_vm0, %v353_v0  ;;  %2489 = vmatprep.subr.msk.mxu1 %vm410_vm0, %v353_v0  ;;  %s3389_s25 = smov (!%p288_p5, %s2566_s25), 1  ;;  %v2580_v1 = vmov 0.0   ;;  %vm361_vm4 = vcmask 31744   ;;  %v2263_v18 = vld [vmem:[%s3372_s2] ss:$0 sm:$0xff] }
  0x10   : > { %2398 = vmatpush3.msk.msra.mxu0 %vm410_vm0, %v353_v0  ;;  %2490 = vmatpush3.msk.msra.mxu1 %vm410_vm0, %v353_v0  ;;  %306 = vst.msk [vmem:[#allocation2] sm:$0xff] %vm305_vm1, %v2580_v1  ;;  %307 = vst.msk [vmem:[#allocation2 + $0x8] sm:$0xff] %vm305_vm1, %v2580_v1  ;;  %s297_s12 = scalar_select %p296_p6, %s2665_s10, 15 }
  0x11   : > { %309 = vst.msk [vmem:[#allocation2 + $0x10] sm:$0x3] %vm308_vm2, %v2580_v1  ;;  %313 = vst.msk [vmem:[#allocation2 + $0xe8] sm:$0x3] %vm308_vm2, %v2580_v1  ;;  %s2335_s13 = sshll.u32 %s3389_s25, 8  ;;  %s2259_s14 = sshll.u32 %s3389_s25, 5 }
  0x12   : > { %311 = vst.msk [vmem:[#allocation2 + $0xd8] sm:$0xff] %vm305_vm1, %v2580_v1  ;;  %312 = vst.msk [vmem:[#allocation2 + $0xe0] sm:$0xff] %vm305_vm1, %v2580_v1  ;;  %s2707_s17 = scalar_lea.vmem %s3370_s0, %s2335_s13  ;;  %s2258_s18 = sshll.u32 %s297_s12, 1 }
  0x13   : > { %316 = vst.msk [vmem:[#allocation2 + $0x18] sm:$0x1] %vm314_vm3, %v2580_v1  ;;  %317 = vst.msk [vmem:[#allocation2 + $0x30] sm:$0x1] %vm314_vm3, %v2580_v1  ;;  %s300_s19 = sadd.s32 %s2259_s14, %s2258_s18  ;;  %s2712_s20 = scalar_lea.vmem %s2707_s17, %s2336_s11 }
  0x14   : > { %318 = vst.msk [vmem:[#allocation2 + $0x48] sm:$0x1] %vm314_vm3, %v2580_v1  ;;  %319 = vst.msk [vmem:[#allocation2 + $0x60] sm:$0x1] %vm314_vm3, %v2580_v1  ;;  %s2260_s21 = sshll.u32 %s300_s19, 3  ;;  %v337_v2 = vld [vmem:[%s2712_s20] sm:$0xff] }
  0x15   : > { %320 = vst.msk [vmem:[#allocation2 + $0x78] sm:$0x1] %vm314_vm3, %v2580_v1  ;;  %321 = vst.msk [vmem:[#allocation2 + $0x90] sm:$0x1] %vm314_vm3, %v2580_v1  ;;  %v345_v3 = vld [vmem:[%s2712_s20 + $0x40] sm:$0xff]  ;;  %v338_v4 = vld [vmem:[%s2712_s20 + $0x8] sm:$0xff]  ;;  %s2720_s25 = scalar_lea.vmem %s3377_s7, %s2260_s21  ;;  %2399 = vmatprep.mubr.msk.f32.mxu0 %vm361_vm4, %v337_v2 }
  0x16   : > { %322 = vst.msk [vmem:[#allocation2 + $0xa8] sm:$0x1] %vm314_vm3, %v2580_v1  ;;  %323 = vst.msk [vmem:[#allocation2 + $0xc0] sm:$0x1] %vm314_vm3, %v2580_v1  ;;  %2411 = vmatprep.mubr.msk.f32.mxu1 %vm361_vm4, %v345_v3  ;;  %v346_v5 = vld [vmem:[%s2712_s20 + $0x48] sm:$0xff]  ;;  %v339_v6 = vld [vmem:[%s2712_s20 + $0x10] sm:$0xff]  ;;  %2400 = vmatmul.mubr.msk.f32.vlgmr.msra.gmra.mxu0 %vm361_vm4, %v338_v4 }
  0x17   : > { %326 = vst.msk [vmem:[#allocation2 + $0x29] sm:$0x1] %vm314_vm3, %v2580_v1  ;;  %327 = vst.msk [vmem:[#allocation2 + $0x41] sm:$0x1] %vm314_vm3, %v2580_v1  ;;  %v347_v7 = vld [vmem:[%s2712_s20 + $0x50] sm:$0xff]  ;;  %2412 = vmatmul.mubr.msk.f32.vlgmr.msra.gmra.mxu1 %vm361_vm4, %v346_v5  ;;  %2402 = vmatprep.mubr.msk.f32.mxu0 %vm361_vm4, %v339_v6  ;;  %v340_v8 = vld [vmem:[%s2712_s20 + $0x18] sm:$0xff] }
  0x18   : > { %328 = vst.msk [vmem:[#allocation2 + $0x59] sm:$0x1] %vm314_vm3, %v2580_v1  ;;  %329 = vst.msk [vmem:[#allocation2 + $0x71] sm:$0x1] %vm314_vm3, %v2580_v1  ;;  %2414 = vmatprep.mubr.msk.f32.mxu1 %vm361_vm4, %v347_v7  ;;  %v348_v9 = vld [vmem:[%s2712_s20 + $0x58] sm:$0xff]  ;;  %v341_v10 = vld [vmem:[%s2712_s20 + $0x20] sm:$0xff] }
  0x19   : > { %330 = vst.msk [vmem:[#allocation2 + $0x89] sm:$0x1] %vm314_vm3, %v2580_v1  ;;  %331 = vst.msk [vmem:[#allocation2 + $0xa1] sm:$0x1] %vm314_vm3, %v2580_v1  ;;  %v349_v11 = vld [vmem:[%s2712_s20 + $0x60] sm:$0xff]  ;;  %v342_v12 = vld [vmem:[%s2712_s20 + $0x28] sm:$0xff] }
  0x1a   : > { %332 = vst.msk [vmem:[#allocation2 + $0xb9] sm:$0x1] %vm314_vm3, %v2580_v1  ;;  %333 = vst.msk [vmem:[#allocation2 + $0xd1] sm:$0x1] %vm314_vm3, %v2580_v1  ;;  %2403 = vmatmul.mubr.msk.f32.gmra.mxu0 %vm361_vm4, %v340_v8  ;;  %v350_v13 = vld [vmem:[%s2712_s20 + $0x68] sm:$0xff]  ;;  %v343_v14 = vld [vmem:[%s2712_s20 + $0x30] sm:$0xff] }
  0x1b   : > { %315 = vst.msk [vmem:[#allocation2] sm:$0x1] %vm314_vm3, %v2580_v1  ;;  %324 = vst.msk [vmem:[#allocation2 + $0xd8] sm:$0x1] %vm314_vm3, %v2580_v1  ;;  %2415 = vmatmul.mubr.msk.f32.gmra.mxu1 %vm361_vm4, %v348_v9  ;;  %2405 = vmatprep.mubr.msk.f32.mxu0 %vm361_vm4, %v341_v10  ;;  %v351_v15 = vld [vmem:[%s2712_s20 + $0x70] sm:$0xff]  ;;  %v344_v16 = vld [vmem:[%s2712_s20 + $0x38] sm:$0xff] }
  0x1c   : > { %325 = vst.msk [vmem:[#allocation2 + $0x11] sm:$0x1] %vm314_vm3, %v2580_v1  ;;  %334 = vst.msk [vmem:[#allocation2 + $0xe9] sm:$0x1] %vm314_vm3, %v2580_v1  ;;  %2417 = vmatprep.mubr.msk.f32.mxu1 %vm361_vm4, %v349_v11  ;;  %v352_v17 = vld [vmem:[%s2712_s20 + $0x78] sm:$0xff]  ;;  %s2282_s13 = sadd.s32 (!%p2281_p7), 4294967295, %s2665_s10 }
  0x1d   : > { %s2283_s14 = sshll.u32 (!%p2281_p7), %s2282_s13, 4 }
  0x1e   : > { %2406 = vmatmul.mubr.msk.f32.gmra.mxu0 %vm361_vm4, %v342_v12  ;;  %s598_s15 = scalar_lea.vmem (!%p2281_p7), %s2707_s17, %s2283_s14 }
  0x1f   : > { %2418 = vmatmul.mubr.msk.f32.gmra.mxu1 %vm361_vm4, %v350_v13  ;;  %2408 = vmatprep.mubr.msk.f32.mxu0 %vm361_vm4, %v343_v14 }
  0x20   : > { %2420 = vmatprep.mubr.msk.f32.mxu1 %vm361_vm4, %v351_v15 }
  0x22   : > { %2409 = vmatmul.mubr.msk.f32.gmra.mxu0 %vm361_vm4, %v344_v16 }
  0x23   : > { %2421 = vmatmul.mubr.msk.f32.gmra.mxu1 %vm361_vm4, %v352_v17 }
  0xd6   : > { %v2401_v19 = vpop.f32.mrf.mxu0 }
  0xd7   : > { %v2413_v20 = vpop.f32.mrf.mxu1  ;;  %v486_v21 = vadd.f32 %v2401_v19, %v2263_v18 }
  0xd8   : > { %v526_v22 = vadd.f32 %v2413_v20, %v2263_v18  ;;  %v480_v23 = vpop.f32.mrf.mxu0 }
  0xd9   : > { %v520_v24 = vpop.f32.mrf.mxu1  ;;  %v560_v25 = vmax.f32 %v486_v21, 0.0  ;;  %v481_v27 = vadd.f32 %v2263_v18, %v480_v23 }
  0xda   : > { %v568_v26 = vmax.f32 %v526_v22, 0.0  ;;  %v521_v28 = vadd.f32 %v2263_v18, %v520_v24  ;;  %v2404_v29 = vpop.f32.mrf.mxu0 }
  0xdb   : > { %v2416_v30 = vpop.f32.mrf.mxu1  ;;  %577 = vst.msk [vmem:[#allocation2 + $0x21] sm:$0xff] %vm305_vm1, %v560_v25  ;;  %v559_v31 = vmax.f32 %v481_v27, 0.0  ;;  %v496_v33 = vadd.f32 %v2404_v29, %v2263_v18 }
  0xdc   : > { %585 = vst.msk [vmem:[#allocation2 + $0x81] sm:$0xff] %vm305_vm1, %v568_v26  ;;  %v567_v32 = vmax.f32 %v521_v28, 0.0  ;;  %v536_v34 = vadd.f32 %v2416_v30, %v2263_v18  ;;  %v490_v35 = vpop.f32.mrf.mxu0 }
  0xdd   : > { %v530_v36 = vpop.f32.mrf.mxu1  ;;  %576 = vst.msk [vmem:[#allocation2 + $0x19] sm:$0xff] %vm305_vm1, %v559_v31  ;;  %v562_v37 = vmax.f32 %v496_v33, 0.0  ;;  %v491_v39 = vadd.f32 %v2263_v18, %v490_v35 }
  0xde   : > { %584 = vst.msk [vmem:[#allocation2 + $0x79] sm:$0xff] %vm305_vm1, %v567_v32  ;;  %v570_v38 = vmax.f32 %v536_v34, 0.0  ;;  %v531_v40 = vadd.f32 %v2263_v18, %v530_v36  ;;  %v2407_v41 = vpop.f32.mrf.mxu0 }
  0xdf   : > { %v2419_v42 = vpop.f32.mrf.mxu1  ;;  %579 = vst.msk [vmem:[#allocation2 + $0x39] sm:$0xff] %vm305_vm1, %v562_v37  ;;  %v561_v43 = vmax.f32 %v491_v39, 0.0  ;;  %v506_v45 = vadd.f32 %v2407_v41, %v2263_v18 }
  0xe0   : > { %587 = vst.msk [vmem:[#allocation2 + $0x99] sm:$0xff] %vm305_vm1, %v570_v38  ;;  %v569_v44 = vmax.f32 %v531_v40, 0.0  ;;  %v546_v46 = vadd.f32 %v2419_v42, %v2263_v18  ;;  %v500_v47 = vpop.f32.mrf.mxu0 }
  0xe1   : > { %v540_v48 = vpop.f32.mrf.mxu1  ;;  %578 = vst.msk [vmem:[#allocation2 + $0x31] sm:$0xff] %vm305_vm1, %v561_v43  ;;  %v564_v49 = vmax.f32 %v506_v45, 0.0  ;;  %v501_v51 = vadd.f32 %v2263_v18, %v500_v47 }
  0xe2   : > { %586 = vst.msk [vmem:[#allocation2 + $0x91] sm:$0xff] %vm305_vm1, %v569_v44  ;;  %v572_v50 = vmax.f32 %v546_v46, 0.0  ;;  %v541_v52 = vadd.f32 %v2263_v18, %v540_v48  ;;  %v2410_v53 = vpop.f32.mrf.mxu0 }
  0xe3   : > { %v2422_v54 = vpop.f32.mrf.mxu1  ;;  %581 = vst.msk [vmem:[#allocation2 + $0x51] sm:$0xff] %vm305_vm1, %v564_v49  ;;  %v563_v55 = vmax.f32 %v501_v51, 0.0  ;;  %v516_v57 = vadd.f32 %v2410_v53, %v2263_v18 }
  0xe4   : > { %589 = vst.msk [vmem:[#allocation2 + $0xb1] sm:$0xff] %vm305_vm1, %v572_v50  ;;  %v571_v56 = vmax.f32 %v541_v52, 0.0  ;;  %v556_v58 = vadd.f32 %v2422_v54, %v2263_v18  ;;  %v510_v59 = vpop.f32.mrf.mxu0 }
  0xe5   : > { %v550_v60 = vpop.f32.mrf.mxu1  ;;  %580 = vst.msk [vmem:[#allocation2 + $0x49] sm:$0xff] %vm305_vm1, %v563_v55  ;;  %v566_v61 = vmax.f32 %v516_v57, 0.0  ;;  %v511_v63 = vadd.f32 %v2263_v18, %v510_v59 }
  0xe6   : > { %588 = vst.msk [vmem:[#allocation2 + $0xa9] sm:$0xff] %vm305_vm1, %v571_v56  ;;  %v574_v62 = vmax.f32 %v556_v58, 0.0  ;;  %v551_v0 = vadd.f32 %v2263_v18, %v550_v60  ;;  %595 = sbr.rel (%p2281_p7) target bundleno = 438 (0x1b6), region = 52 }
  0xe7   : > { %583 = vst.msk [vmem:[#allocation2 + $0x69] sm:$0xff] %vm305_vm1, %v566_v61  ;;  %v565_v1 = vmax.f32 %v511_v63, 0.0 }
  0xe8   : > { %591 = vst.msk [vmem:[#allocation2 + $0xc9] sm:$0xff] %vm305_vm1, %v574_v62  ;;  %v573_v2 = vmax.f32 %v551_v0, 0.0 }
  0xe9   : > { %582 = vst.msk [vmem:[#allocation2 + $0x61] sm:$0xff] %vm305_vm1, %v565_v1 }
  0xea   : > { %590 = vst.msk [vmem:[#allocation2 + $0xc1] sm:$0xff] %vm305_vm1, %v573_v2 }
  0xeb   : > { %v601_v3 = vld [vmem:[%s3371_s1] sm:$0xf]  ;;  %v600_v5 = vld [vmem:[%s598_s15 + $0x8] sm:$0xff] }
  0xec   : > { %2423 = vmatprep.subr.msk.mxu0 %vm410_vm0, %v601_v3  ;;  %v599_v4 = vld [vmem:[%s598_s15] sm:$0xff] }
  0xed   : > { %2424 = vmatpush3.msk.msra.mxu0 %vm410_vm0, %v601_v3  ;;  %2425 = vmatprep.mubr.msk.f32.mxu0 %vm361_vm4, %v599_v4  ;;  %v2284_v6 = vld [vmem:[%s3372_s2] ss:$0 sm:$0xff] }
  0xee   : > { %2426 = vmatmul.mubr.msk.f32.vlgmr.msra.gmra.mxu0 %vm361_vm4, %v600_v5 }
 0x1ae   : > { %v2427_v7 = vpop.f32.mrf.mxu0 }
 0x1af   : > { %v690_v8 = vadd.f32 %v2427_v7, %v2284_v6 }
 0x1b0   : > { %v684_v9 = vpop.f32.mrf.mxu0 }
 0x1b1   : > { %v694_v10 = vmax.f32 %v690_v8, 0.0  ;;  %v685_v11 = vadd.f32 %v2284_v6, %v684_v9 }
 0x1b3   : > { %696 = vst.msk [vmem:[#allocation2 + $0x9] sm:$0xff] %vm305_vm1, %v694_v10  ;;  %v693_v12 = vmax.f32 %v685_v11, 0.0 }
 0x1b5   : > { %695 = vst.msk [vmem:[#allocation2 + $0x1] sm:$0xff] %vm305_vm1, %v693_v12 }
 0x1b6 PF: > { %p2288_p8 = scmp.ge.s32.totalorder %s2562_s24, 1 }
 0x1b8   : > { %700 = sbr.rel (%p2288_p8) target bundleno = 648 (0x288), region = 56 }
 0x1bd   : > { %v706_v13 = vld [vmem:[%s3371_s1] sm:$0xf]  ;;  %v2292_v15 = vld [vmem:[%s2712_s20 + $0x88] sm:$0xff] }
 0x1be   : > { %v2291_v14 = vld [vmem:[%s2712_s20 + $0x80] sm:$0xff]  ;;  %2428 = vmatprep.subr.msk.mxu0 %vm410_vm0, %v706_v13 }
 0x1bf   : > { %2430 = vmatprep.mubr.msk.f32.mxu0 %vm361_vm4, %v2291_v14  ;;  %2429 = vmatpush3.msk.msra.mxu0 %vm410_vm0, %v706_v13  ;;  %v2293_v16 = vld [vmem:[%s3372_s2] ss:$0 sm:$0xff] }
 0x1c0   : > { %2431 = vmatmul.mubr.msk.f32.vlgmr.msra.gmra.mxu0 %vm361_vm4, %v2292_v15 }
 0x280   : > { %v2432_v17 = vpop.f32.mrf.mxu0 }
 0x281   : > { %v795_v18 = vadd.f32 %v2432_v17, %v2293_v16 }
 0x282   : > { %v789_v19 = vpop.f32.mrf.mxu0 }
 0x283   : > { %v799_v20 = vmax.f32 %v795_v18, 0.0  ;;  %v790_v21 = vadd.f32 %v2293_v16, %v789_v19 }
 0x285   : > { %801 = vst.msk [vmem:[#allocation2 + $0xe1] sm:$0xff] %vm305_vm1, %v799_v20  ;;  %v798_v22 = vmax.f32 %v790_v21, 0.0 }
 0x287   : > { %800 = vst.msk [vmem:[#allocation2 + $0xd9] sm:$0xff] %vm305_vm1, %v798_v22 }
 0x288 PF: > { %v931_v23 = vld [vmem:[#allocation2 + $0x2] sm:$0xff]  ;;  %s2581_s24 = smov 4   ;;  %s2582_s20 = smov 2   ;;  %v1028_v26 = vld [vmem:[#allocation2 + $0x18] sm:$0xff]  ;;  %v932_v27 = vld [vmem:[#allocation2 + $0xa] sm:$0xff]  ;;  %vm1686_vm5 = vcmask 1041408  }
 0x289   : > { %v834_v24 = vld [vmem:[#allocation2 + $0x1] sm:$0xff]  ;;  %963 = vrot.lane.b32.xlu1 %v931_v23, %s2581_s24  ;;  %v835_v28 = vld [vmem:[#allocation2 + $0x9] sm:$0xff]  ;;  %v836_v29 = vld [vmem:[#allocation2 + $0x19] sm:$0xff]  ;;  %820 = vst.msk [vmem:[#allocation3 + $0x10] sm:$0xff] %vm305_vm1, %v1028_v26  ;;  %s2583_s22 = smov 6   ;;  %s2584_s23 = smov 8  }
 0x28a   : > { %866 = vrot.lane.b32.xlu0 %v834_v24, %s2582_s20  ;;  %v1029_v25 = vld [vmem:[#allocation2 + $0x20] sm:$0xff]  ;;  %v1320_v30 = vld [vmem:[#allocation2 + $0x30] sm:$0xff]  ;;  %2465 = vmatprep.mubr.msk.f32.mxu1 %vm305_vm1, %v836_v29  ;;  %v1321_v31 = vld [vmem:[#allocation2 + $0x38] sm:$0xff]  ;;  %s2585_s8 = smov 10   ;;  %s2586_s9 = smov 12   ;;  %vm914_vm6 = vcmask 31760  }
 0x28b   : > { %821 = vst.msk [vmem:[#allocation3 + $0x18] sm:$0xff] %vm305_vm1, %v1029_v25  ;;  %822 = vst.msk [vmem:[#allocation3 + $0x20] sm:$0xff] %vm305_vm1, %v1320_v30  ;;  %v2808_v32 = vld [vmem:[#allocation2 + $0x48] sm:$0xff]  ;;  %v2811_v33 = vld [vmem:[#allocation2 + $0x50] sm:$0xff]  ;;  %s2587_s11 = smov 14   ;;  %s2588_s16 = smov 16  }
 0x28c   : > { %823 = vst.msk [vmem:[#allocation3 + $0x28] sm:$0xff] %vm305_vm1, %v1321_v31  ;;  %824 = vst.msk [vmem:[#allocation3 + $0x30] sm:$0xff] %vm305_vm1, %v2808_v32  ;;  %v2815_v34 = vld [vmem:[#allocation2 + $0x60] sm:$0xff]  ;;  %v2819_v35 = vld [vmem:[#allocation2 + $0x68] sm:$0xff]  ;;  %vm1011_vm7 = vcmask 48160   ;;  %vm1108_vm8 = vcmask 64560  }
 0x28d   : > { %965 = vrot.lane.b32.xlu1 %v932_v27, %s2581_s24  ;;  %825 = vst.msk [vmem:[#allocation3 + $0x38] sm:$0xff] %vm305_vm1, %v2811_v33  ;;  %826 = vst.msk [vmem:[#allocation3 + $0x40] sm:$0xff] %vm305_vm1, %v2815_v34  ;;  %v802_v36 = vld [vmem:[#allocation2] sm:$0xff]  ;;  %v803_v37 = vld [vmem:[#allocation2 + $0x8] sm:$0xff]  ;;  %vm1205_vm9 = vcmask 80960   ;;  %vm1302_vm10 = vcmask 97360  }
 0x28e   : > { %868 = vrot.lane.b32.xlu0 %v835_v28, %s2582_s20  ;;  %827 = vst.msk [vmem:[#allocation3 + $0x48] sm:$0xff] %vm305_vm1, %v2819_v35  ;;  %818 = vst.msk [vmem:[#allocation3] sm:$0xff] %vm305_vm1, %v802_v36  ;;  %v2829_v38 = vld [vmem:[#allocation2 + $0x78] sm:$0xff]  ;;  %v2831_v39 = vld [vmem:[#allocation2 + $0x80] sm:$0xff]  ;;  %vm1400_vm11 = vcmask 113760   ;;  %vm1497_vm12 = vcmask 130160  }
 0x28f   : > { %819 = vst.msk [vmem:[#allocation3 + $0x8] sm:$0xff] %vm305_vm1, %v803_v37  ;;  %828 = vst.msk [vmem:[#allocation3 + $0x50] sm:$0xff] %vm305_vm1, %v2829_v38  ;;  %v1222_v40 = vld [vmem:[#allocation2 + $0x1a] sm:$0xff]  ;;  %v1223_v42 = vld [vmem:[#allocation2 + $0x22] sm:$0xff]  ;;  %vm1594_vm13 = vcmask 146560   ;;  %vm1637_vm14 = vcmask 146432  }
 0x290   : > { %829 = vst.msk [vmem:[#allocation3 + $0x58] sm:$0xff] %vm305_vm1, %v2831_v39  ;;  %v2839_v41 = vld [vmem:[#allocation2 + $0x21] sm:$0xff]  ;;  %v2847_v43 = vld [vmem:[#allocation2 + $0x90] sm:$0xff]  ;;  %v2857_v45 = vld [vmem:[#allocation2 + $0x98] sm:$0xff]  ;;  %vm2135_vm15 = vcmask 64544  }
 0x291   : > { %1062 = vrot.lane.b32.xlu1 %v1029_v25, %s2583_s22  ;;  %830 = vst.msk [vmem:[#allocation3 + $0x60] sm:$0xff] %vm305_vm1, %v2847_v43  ;;  %v2855_v44 = vld [vmem:[#allocation2 + $0x31] sm:$0xff]  ;;  %831 = vst.msk [vmem:[#allocation3 + $0x68] sm:$0xff] %vm305_vm1, %v2857_v45  ;;  %v2870_v48 = vld [vmem:[#allocation2 + $0x39] sm:$0xff] }
 0x292   : > { %1060 = vrot.lane.b32.xlu0 %v1028_v26, %s2583_s22  ;;  %v1629_v46 = vld [vmem:[%s3375_s5 + $0x10] sm:$0x3]  ;;  %v1514_v47 = vld [vmem:[#allocation2 + $0x32] sm:$0xff]  ;;  %v1628_v49 = vld [vmem:[%s3375_s5 + $0x8] sm:$0xff] }
 0x293   : > { %2433 = vmatprep.subr.msk.mxu0 %vm1686_vm5, %v1629_v46  ;;  %v1627_v50 = vld [vmem:[%s3375_s5] sm:$0xff]  ;;  %v2892_v52 = vld [vmem:[#allocation2 + $0xa8] sm:$0xff]  ;;  %v2904_v54 = vld [vmem:[#allocation2 + $0xb0] sm:$0xff] }
 0x294   : > { %2434 = vmatpush3.msk.msra.mxu0 %vm1686_vm5, %v1629_v46  ;;  %v1515_v51 = vld [vmem:[#allocation2 + $0x3a] sm:$0xff]  ;;  %832 = vst.msk [vmem:[#allocation3 + $0x70] sm:$0xff] %vm305_vm1, %v2892_v52  ;;  %v2902_v53 = vld [vmem:[#allocation2 + $0x49] sm:$0xff]  ;;  %833 = vst.msk [vmem:[#allocation3 + $0x78] sm:$0xff] %vm305_vm1, %v2904_v54 }
 0x295   : > { %870 = vrot.lane.b32.xlu1 %v836_v29, %s2582_s20  ;;  %2435 = vmatprep.subr.mxu0 %v1628_v49  ;;  %v1516_v55 = vld [vmem:[#allocation2 + $0x4a] sm:$0xff]  ;;  %v1517_v57 = vld [vmem:[#allocation2 + $0x52] sm:$0xff]  ;;  %v2936_v58 = vld [vmem:[#allocation2 + $0x61] sm:$0xff] }
 0x296   : > { %1157 = vrot.lane.b32.xlu0 %v836_v29, %s2584_s23  ;;  %2436 = vmatpush3.msra.mxu0 %v1628_v49  ;;  %v2916_v56 = vld [vmem:[#allocation2 + $0x51] sm:$0xff]  ;;  %v1518_v59 = vld [vmem:[#allocation2 + $0x62] sm:$0xff]  ;;  %v2972_v4 = vld [vmem:[#allocation2 + $0x79] sm:$0xff] }
 0x297   : > { %2437 = vmatprep.subr.mxu0 %v1627_v50  ;;  %v2946_v60 = vld [vmem:[#allocation2 + $0x69] sm:$0xff]  ;;  %v1520_v9 = vld [vmem:[#allocation2 + $0x7a] sm:$0xff]  ;;  %v1425_v25 = vld [vmem:[#allocation2 + $0x91] sm:$0xff] }
 0x298   : > { %2438 = vmatpush3.msra.mxu0 %v1627_v50  ;;  %v1519_v61 = vld [vmem:[#allocation2 + $0x6a] sm:$0xff]  ;;  %v2986_v10 = vld [vmem:[#allocation2 + $0x81] sm:$0xff] }
 0x299   : > { %1254 = vrot.lane.b32.xlu1 %v1222_v40, %s2585_s8  ;;  %v1521_v15 = vld [vmem:[#allocation2 + $0x82] sm:$0xff]  ;;  %v1851_v24 = vld [vmem:[%s3373_s3] sm:$0x3] }
 0x29a   : > { %1159 = vrot.lane.b32.xlu0 %v2839_v41, %s2584_s23  ;;  %2463 = vmatprep.subr.msk.mxu1 %vm1686_vm5, %v1851_v24 }
 0x29b   : > { %2464 = vmatpush3.msk.msra.mxu1 %vm1686_vm5, %v1851_v24  ;;  %v1335_v24 = vld [vmem:[#allocation2 + $0xe0] sm:$0xff] }
 0x29c   : > { %2466 = vmatmul.mubr.msk.f32.vlgmr.msra.gmra.mxu1 %vm305_vm1, %v2839_v41 }
 0x29d   : > { %967 = vrot.lane.b32.xlu1 %v1222_v40, %s2581_s24  ;;  %2468 = vmatprep.mubr.msk.f32.mxu1 %vm305_vm1, %v2855_v44 }
 0x29e   : > { %872 = vrot.lane.b32.xlu0 %v2839_v41, %s2582_s20 }
 0x2a0   : > { %2469 = vmatmul.mubr.msk.f32.gmra.mxu1 %vm305_vm1, %v2870_v48 }
 0x2a1   : > { %1352 = vrot.lane.b32.xlu1 %v1320_v30, %s2586_s9  ;;  %2471 = vmatprep.mubr.msk.f32.mxu1 %vm305_vm1, %v2902_v53 }
 0x2a2   : > { %1256 = vrot.lane.b32.xlu0 %v1223_v42, %s2585_s8 }
 0x2a4   : > { %2472 = vmatmul.mubr.msk.f32.gmra.mxu1 %vm305_vm1, %v2916_v56 }
 0x2a5   : > { %1064 = vrot.lane.b32.xlu1 %v1320_v30, %s2583_s22  ;;  %2474 = vmatprep.mubr.msk.f32.mxu1 %vm305_vm1, %v2936_v58 }
 0x2a6   : > { %969 = vrot.lane.b32.xlu0 %v1223_v42, %s2581_s24 }
 0x2a8   : > { %2475 = vmatmul.mubr.msk.f32.gmra.mxu1 %vm305_vm1, %v2946_v60 }
 0x2a9   : > { %1449 = vrot.lane.b32.xlu1 %v2855_v44, %s2587_s11  ;;  %2477 = vmatprep.mubr.msk.f32.mxu1 %vm305_vm1, %v2972_v4 }
 0x2aa   : > { %1354 = vrot.lane.b32.xlu0 %v1321_v31, %s2586_s9 }
 0x2ac   : > { %2478 = vmatmul.mubr.msk.f32.gmra.mxu1 %vm305_vm1, %v2986_v10 }
 0x2ad   : > { %1161 = vrot.lane.b32.xlu1 %v2855_v44, %s2584_s23  ;;  %2480 = vmatprep.mubr.msk.f32.mxu1 %vm305_vm1, %v1425_v25 }
 0x2ae   : > { %1066 = vrot.lane.b32.xlu0 %v1321_v31, %s2583_s22  ;;  %v1522_v31 = vld [vmem:[#allocation2 + $0x92] sm:$0xff] }
 0x2b1   : > { %1546 = vrot.lane.b32.xlu1 %v1514_v47, %s2588_s16 }
 0x2b2   : > { %1451 = vrot.lane.b32.xlu0 %v2870_v48, %s2587_s11 }
 0x2b5   : > { %1163 = vrot.lane.b32.xlu1 %v2870_v48, %s2584_s23 }
 0x2b6   : > { %874 = vrot.lane.b32.xlu0 %v2855_v44, %s2582_s20  ;;  %v1428_v44 = vld [vmem:[#allocation2 + $0xb1] sm:$0xff] }
 0x2b9   : > { %1548 = vrot.lane.b32.xlu1 %v1515_v51, %s2588_s16 }
 0x2ba   : > { %1258 = vrot.lane.b32.xlu0 %v1514_v47, %s2585_s8 }
 0x2bd   : > { %971 = vrot.lane.b32.xlu1 %v1514_v47, %s2581_s24  ;;  %v3072_v47 = vld [vmem:[#allocation2 + $0xc1] sm:$0xff] }
 0x2be   : > { %876 = vrot.lane.b32.xlu0 %v2870_v48, %s2582_s20  ;;  %v3082_v48 = vld [vmem:[#allocation2 + $0xc9] sm:$0xff] }
 0x2c1   : > { %1356 = vrot.lane.b32.xlu1 %v2808_v32, %s2586_s9 }
 0x2c2   : > { %1260 = vrot.lane.b32.xlu0 %v1515_v51, %s2585_s8 }
 0x2c5   : > { %1068 = vrot.lane.b32.xlu1 %v2808_v32, %s2583_s22  ;;  %v1426_v32 = vld [vmem:[#allocation2 + $0x99] sm:$0xff] }
 0x2c6   : > { %973 = vrot.lane.b32.xlu0 %v1515_v51, %s2581_s24  ;;  %2481 = vmatmul.mubr.msk.f32.gmra.mxu1 %vm305_vm1, %v1426_v32 }
 0x2c9   : > { %1453 = vrot.lane.b32.xlu1 %v2902_v53, %s2587_s11 }
 0x2ca   : > { %1358 = vrot.lane.b32.xlu0 %v2811_v33, %s2586_s9 }
 0x2cd   : > { %1165 = vrot.lane.b32.xlu1 %v2902_v53, %s2584_s23 }
 0x2ce   : > { %1070 = vrot.lane.b32.xlu0 %v2811_v33, %s2583_s22 }
 0x2d1   : > { %1550 = vrot.lane.b32.xlu1 %v1516_v55, %s2588_s16 }
 0x2d2   : > { %1455 = vrot.lane.b32.xlu0 %v2916_v56, %s2587_s11 }
 0x2d5   : > { %1167 = vrot.lane.b32.xlu1 %v2916_v56, %s2584_s23 }
 0x2d6   : > { %878 = vrot.lane.b32.xlu0 %v2902_v53, %s2582_s20 }
 0x2d9   : > { %1552 = vrot.lane.b32.xlu1 %v1517_v57, %s2588_s16 }
 0x2da   : > { %1262 = vrot.lane.b32.xlu0 %v1516_v55, %s2585_s8 }
 0x2dd   : > { %975 = vrot.lane.b32.xlu1 %v1516_v55, %s2581_s24 }
 0x2de   : > { %880 = vrot.lane.b32.xlu0 %v2916_v56, %s2582_s20 }
 0x2e1   : > { %1360 = vrot.lane.b32.xlu1 %v2815_v34, %s2586_s9 }
 0x2e2   : > { %1264 = vrot.lane.b32.xlu0 %v1517_v57, %s2585_s8 }
 0x2e5   : > { %1072 = vrot.lane.b32.xlu1 %v2815_v34, %s2583_s22 }
 0x2e6   : > { %977 = vrot.lane.b32.xlu0 %v1517_v57, %s2581_s24 }
 0x2e9   : > { %1457 = vrot.lane.b32.xlu1 %v2936_v58, %s2587_s11 }
 0x2ea   : > { %1362 = vrot.lane.b32.xlu0 %v2819_v35, %s2586_s9 }
 0x2ed   : > { %1169 = vrot.lane.b32.xlu1 %v2936_v58, %s2584_s23 }
 0x2ee   : > { %1074 = vrot.lane.b32.xlu0 %v2819_v35, %s2583_s22 }
 0x2f1   : > { %1554 = vrot.lane.b32.xlu1 %v1518_v59, %s2588_s16 }
 0x2f2   : > { %1459 = vrot.lane.b32.xlu0 %v2946_v60, %s2587_s11 }
 0x2f5   : > { %1171 = vrot.lane.b32.xlu1 %v2946_v60, %s2584_s23 }
 0x2f6   : > { %882 = vrot.lane.b32.xlu0 %v2936_v58, %s2582_s20 }
 0x2f9   : > { %1556 = vrot.lane.b32.xlu1 %v1519_v61, %s2588_s16 }
 0x2fa   : > { %1266 = vrot.lane.b32.xlu0 %v1518_v59, %s2585_s8 }
 0x2fb   : > { %v964_v62 = vpop.permute.xlu1 %963 }
 0x2fc   : > { %v867_v63 = vpop.permute.xlu0 %866 }
 0x2fd   : > { %915 = vst.msk [vmem:[#allocation3] sm:$0xff] %vm914_vm6, %v867_v63  ;;  %979 = vrot.lane.b32.xlu1 %v1518_v59, %s2581_s24 }
 0x2fe   : > { %884 = vrot.lane.b32.xlu0 %v2946_v60, %s2582_s20  ;;  %1012 = vst.msk [vmem:[#allocation3] sm:$0xff] %vm1011_vm7, %v964_v62 }
 0x2ff   : > { %v966_v0 = vpop.permute.xlu1 %965 }
 0x300   : > { %v869_v1 = vpop.permute.xlu0 %868 }
 0x301   : > { %916 = vst.msk [vmem:[#allocation3 + $0x8] sm:$0xff] %vm914_vm6, %v869_v1  ;;  %1364 = vrot.lane.b32.xlu1 %v2829_v38, %s2586_s9 }
 0x302   : > { %1268 = vrot.lane.b32.xlu0 %v1519_v61, %s2585_s8  ;;  %1013 = vst.msk [vmem:[#allocation3 + $0x8] sm:$0xff] %vm1011_vm7, %v966_v0 }
 0x303   : > { %v1063_v2 = vpop.permute.xlu1 %1062 }
 0x304   : > { %v1061_v3 = vpop.permute.xlu0 %1060  ;;  %1110 = vst.msk [vmem:[#allocation3 + $0x8] sm:$0xff] %vm1108_vm8, %v1063_v2 }
 0x305   : > { %1109 = vst.msk [vmem:[#allocation3] sm:$0xff] %vm1108_vm8, %v1061_v3  ;;  %1076 = vrot.lane.b32.xlu1 %v2829_v38, %s2583_s22  ;;  %v1523_v38 = vld [vmem:[#allocation2 + $0x9a] sm:$0xff] }
 0x306   : > { %981 = vrot.lane.b32.xlu0 %v1519_v61, %s2581_s24  ;;  %v1332_v3 = vld [vmem:[#allocation2 + $0xc0] sm:$0xff] }
 0x307   : > { %v871_v5 = vpop.permute.xlu1 %870 }
 0x308   : > { %v1158_v6 = vpop.permute.xlu0 %1157  ;;  %917 = vst.msk [vmem:[#allocation3 + $0x10] sm:$0xff] %vm914_vm6, %v871_v5 }
 0x309   : > { %1206 = vst.msk [vmem:[#allocation3] sm:$0xff] %vm1205_vm9, %v1158_v6  ;;  %1461 = vrot.lane.b32.xlu1 %v2972_v4, %s2587_s11 }
 0x30a   : > { %1366 = vrot.lane.b32.xlu0 %v2831_v39, %s2586_s9 }
 0x30b   : > { %v1255_v7 = vpop.permute.xlu1 %1254 }
 0x30c   : > { %v1160_v8 = vpop.permute.xlu0 %1159  ;;  %1303 = vst.msk [vmem:[#allocation3] sm:$0xff] %vm1302_vm10, %v1255_v7 }
 0x30d   : > { %1207 = vst.msk [vmem:[#allocation3 + $0x8] sm:$0xff] %vm1205_vm9, %v1160_v8  ;;  %1173 = vrot.lane.b32.xlu1 %v2972_v4, %s2584_s23  ;;  %v1333_v8 = vld [vmem:[#allocation2 + $0xc8] sm:$0xff] }
 0x30e   : > { %1078 = vrot.lane.b32.xlu0 %v2831_v39, %s2583_s22 }
 0x30f   : > { %v968_v11 = vpop.permute.xlu1 %967 }
 0x310   : > { %v873_v12 = vpop.permute.xlu0 %872  ;;  %1014 = vst.msk [vmem:[#allocation3 + $0x10] sm:$0xff] %vm1011_vm7, %v968_v11 }
 0x311   : > { %918 = vst.msk [vmem:[#allocation3 + $0x18] sm:$0xff] %vm914_vm6, %v873_v12  ;;  %1558 = vrot.lane.b32.xlu1 %v1520_v9, %s2588_s16 }
 0x312   : > { %1463 = vrot.lane.b32.xlu0 %v2986_v10, %s2587_s11 }
 0x313   : > { %v1353_v13 = vpop.permute.xlu1 %1352 }
 0x314   : > { %v1257_v14 = vpop.permute.xlu0 %1256  ;;  %1401 = vst.msk [vmem:[#allocation3] sm:$0xff] %vm1400_vm11, %v1353_v13 }
 0x315   : > { %1304 = vst.msk [vmem:[#allocation3 + $0x8] sm:$0xff] %vm1302_vm10, %v1257_v14  ;;  %1175 = vrot.lane.b32.xlu1 %v2986_v10, %s2584_s23  ;;  %v1526_v14 = vld [vmem:[#allocation2 + $0xc2] sm:$0xff] }
 0x316   : > { %886 = vrot.lane.b32.xlu0 %v2972_v4, %s2582_s20 }
 0x317   : > { %v1065_v16 = vpop.permute.xlu1 %1064 }
 0x318   : > { %v970_v17 = vpop.permute.xlu0 %969  ;;  %1111 = vst.msk [vmem:[#allocation3 + $0x10] sm:$0xff] %vm1108_vm8, %v1065_v16 }
 0x319   : > { %1015 = vst.msk [vmem:[#allocation3 + $0x18] sm:$0xff] %vm1011_vm7, %v970_v17  ;;  %1560 = vrot.lane.b32.xlu1 %v1521_v15, %s2588_s16 }
 0x31a   : > { %1270 = vrot.lane.b32.xlu0 %v1520_v9, %s2585_s8 }
 0x31b   : > { %v1450_v18 = vpop.permute.xlu1 %1449 }
 0x31c   : > { %v1355_v19 = vpop.permute.xlu0 %1354  ;;  %1498 = vst.msk [vmem:[#allocation3] sm:$0xff] %vm1497_vm12, %v1450_v18 }
 0x31d   : > { %1402 = vst.msk [vmem:[#allocation3 + $0x8] sm:$0xff] %vm1400_vm11, %v1355_v19  ;;  %983 = vrot.lane.b32.xlu1 %v1520_v9, %s2581_s24 }
 0x31e   : > { %888 = vrot.lane.b32.xlu0 %v2986_v10, %s2582_s20 }
 0x31f   : > { %v1162_v20 = vpop.permute.xlu1 %1161 }
 0x320   : > { %v1067_v21 = vpop.permute.xlu0 %1066  ;;  %1208 = vst.msk [vmem:[#allocation3 + $0x10] sm:$0xff] %vm1205_vm9, %v1162_v20  ;;  %v1527_v20 = vld [vmem:[#allocation2 + $0xca] sm:$0xff] }
 0x321   : > { %1112 = vst.msk [vmem:[#allocation3 + $0x18] sm:$0xff] %vm1108_vm8, %v1067_v21  ;;  %1368 = vrot.lane.b32.xlu1 %v2847_v43, %s2586_s9 }
 0x322   : > { %1272 = vrot.lane.b32.xlu0 %v1521_v15, %s2585_s8 }
 0x323   : > { %v1547_v22 = vpop.permute.xlu1 %1546 }
 0x324   : > { %v1452_v23 = vpop.permute.xlu0 %1451  ;;  %1595 = vst.msk [vmem:[#allocation3] sm:$0xff] %vm1594_vm13, %v1547_v22 }
 0x325   : > { %1499 = vst.msk [vmem:[#allocation3 + $0x8] sm:$0xff] %vm1497_vm12, %v1452_v23  ;;  %1080 = vrot.lane.b32.xlu1 %v2847_v43, %s2583_s22  ;;  %v1427_v43 = vld [vmem:[#allocation2 + $0xa9] sm:$0xff]  ;;  %v1334_v23 = vld [vmem:[#allocation2 + $0xd8] sm:$0xff] }
 0x326   : > { %985 = vrot.lane.b32.xlu0 %v1521_v15, %s2581_s24  ;;  %2483 = vmatprep.mubr.msk.f32.mxu1 %vm305_vm1, %v1427_v43 }
 0x327   : > { %v1164_v26 = vpop.permute.xlu1 %1163  ;;  %2484 = vmatmul.mubr.msk.f32.gmra.mxu1 %vm305_vm1, %v1428_v44 }
 0x328   : > { %v875_v27 = vpop.permute.xlu0 %874  ;;  %1209 = vst.msk [vmem:[#allocation3 + $0x18] sm:$0xff] %vm1205_vm9, %v1164_v26  ;;  %2486 = vmatprep.mubr.msk.f32.mxu1 %vm305_vm1, %v3072_v47 }
 0x329   : > { %919 = vst.msk [vmem:[#allocation3 + $0x20] sm:$0xff] %vm914_vm6, %v875_v27  ;;  %1465 = vrot.lane.b32.xlu1 %v1425_v25, %s2587_s11  ;;  %v1431_v27 = vld [vmem:[#allocation2 + $0xd9] sm:$0xff] }
 0x32a   : > { %1370 = vrot.lane.b32.xlu0 %v2857_v45, %s2586_s9 }
 0x32b   : > { %v1549_v28 = vpop.permute.xlu1 %1548  ;;  %v1611_v30 = vld [vmem:[#allocation3] sm:$0xff]  ;;  %2487 = vmatmul.mubr.msk.f32.gmra.mxu1 %vm305_vm1, %v3082_v48 }
 0x32c   : > { %v1259_v29 = vpop.permute.xlu0 %1258  ;;  %1596 = vst.msk [vmem:[#allocation3 + $0x8] sm:$0xff] %vm1594_vm13, %v1549_v28  ;;  %2439 = vmatprep.mubr.msk.f32.mxu0 %vm1637_vm14, %v1611_v30  ;;  %v1432_v28 = vld [vmem:[#allocation2 + $0xe1] sm:$0xff] }
 0x32d   : > { %1305 = vst.msk [vmem:[#allocation3 + $0x10] sm:$0xff] %vm1302_vm10, %v1259_v29  ;;  %1177 = vrot.lane.b32.xlu1 %v1425_v25, %s2584_s23 }
 0x32e   : > { %1082 = vrot.lane.b32.xlu0 %v2857_v45, %s2583_s22 }
 0x32f   : > { %v972_v33 = vpop.permute.xlu1 %971 }
 0x330   : > { %v877_v34 = vpop.permute.xlu0 %876  ;;  %1016 = vst.msk [vmem:[#allocation3 + $0x20] sm:$0xff] %vm1011_vm7, %v972_v33 }
 0x331   : > { %920 = vst.msk [vmem:[#allocation3 + $0x28] sm:$0xff] %vm914_vm6, %v877_v34  ;;  %1562 = vrot.lane.b32.xlu1 %v1522_v31, %s2588_s16 }
 0x332   : > { %1467 = vrot.lane.b32.xlu0 %v1426_v32, %s2587_s11 }
 0x333   : > { %v1357_v35 = vpop.permute.xlu1 %1356  ;;  %v1612_v37 = vld [vmem:[#allocation3 + $0x8] sm:$0xff] }
 0x334   : > { %v1261_v36 = vpop.permute.xlu0 %1260  ;;  %1403 = vst.msk [vmem:[#allocation3 + $0x10] sm:$0xff] %vm1400_vm11, %v1357_v35  ;;  %2440 = vmatmul.mubr.msk.f32.vlgmr.msra.gmra.mxu0 %vm1637_vm14, %v1612_v37 }
 0x335   : > { %1306 = vst.msk [vmem:[#allocation3 + $0x18] sm:$0xff] %vm1302_vm10, %v1261_v36  ;;  %1179 = vrot.lane.b32.xlu1 %v1426_v32, %s2584_s23 }
 0x336   : > { %890 = vrot.lane.b32.xlu0 %v1425_v25, %s2582_s20 }
 0x337   : > { %v1069_v39 = vpop.permute.xlu1 %1068 }
 0x338   : > { %v974_v40 = vpop.permute.xlu0 %973  ;;  %1113 = vst.msk [vmem:[#allocation3 + $0x20] sm:$0xff] %vm1108_vm8, %v1069_v39 }
 0x339   : > { %1017 = vst.msk [vmem:[#allocation3 + $0x28] sm:$0xff] %vm1011_vm7, %v974_v40  ;;  %1564 = vrot.lane.b32.xlu1 %v1523_v38, %s2588_s16 }
 0x33a   : > { %1274 = vrot.lane.b32.xlu0 %v1522_v31, %s2585_s8 }
 0x33b   : > { %v1454_v41 = vpop.permute.xlu1 %1453 }
 0x33c   : > { %v1359_v42 = vpop.permute.xlu0 %1358  ;;  %1500 = vst.msk [vmem:[#allocation3 + $0x10] sm:$0xff] %vm1497_vm12, %v1454_v41 }
 0x33d   : > { %1404 = vst.msk [vmem:[#allocation3 + $0x18] sm:$0xff] %vm1400_vm11, %v1359_v42  ;;  %987 = vrot.lane.b32.xlu1 %v1522_v31, %s2581_s24  ;;  %v1528_v31 = vld [vmem:[#allocation2 + $0xda] sm:$0xff] }
 0x33e   : > { %892 = vrot.lane.b32.xlu0 %v1426_v32, %s2582_s20  ;;  %v1529_v32 = vld [vmem:[#allocation2 + $0xe2] sm:$0xff] }
 0x33f   : > { %v1166_v45 = vpop.permute.xlu1 %1165 }
 0x340   : > { %v1071_v46 = vpop.permute.xlu0 %1070  ;;  %1210 = vst.msk [vmem:[#allocation3 + $0x20] sm:$0xff] %vm1205_vm9, %v1166_v45 }
 0x341   : > { %1114 = vst.msk [vmem:[#allocation3 + $0x28] sm:$0xff] %vm1108_vm8, %v1071_v46  ;;  %1372 = vrot.lane.b32.xlu1 %v2892_v52, %s2586_s9 }
 0x342   : > { %1276 = vrot.lane.b32.xlu0 %v1523_v38, %s2585_s8 }
 0x343   : > { %v1551_v49 = vpop.permute.xlu1 %1550 }
 0x344   : > { %v1456_v50 = vpop.permute.xlu0 %1455  ;;  %1597 = vst.msk [vmem:[#allocation3 + $0x10] sm:$0xff] %vm1594_vm13, %v1551_v49 }
 0x345   : > { %1501 = vst.msk [vmem:[#allocation3 + $0x18] sm:$0xff] %vm1497_vm12, %v1456_v50  ;;  %1084 = vrot.lane.b32.xlu1 %v2892_v52, %s2583_s22  ;;  %v1524_v52 = vld [vmem:[#allocation2 + $0xaa] sm:$0xff] }
 0x346   : > { %989 = vrot.lane.b32.xlu0 %v1523_v38, %s2581_s24 }
 0x347   : > { %v1168_v51 = vpop.permute.xlu1 %1167 }
 0x348   : > { %v879_v53 = vpop.permute.xlu0 %878  ;;  %1211 = vst.msk [vmem:[#allocation3 + $0x28] sm:$0xff] %vm1205_vm9, %v1168_v51 }
 0x349   : > { %921 = vst.msk [vmem:[#allocation3 + $0x30] sm:$0xff] %vm914_vm6, %v879_v53  ;;  %1469 = vrot.lane.b32.xlu1 %v1427_v43, %s2587_s11 }
 0x34a   : > { %1374 = vrot.lane.b32.xlu0 %v2904_v54, %s2586_s9 }
 0x34b   : > { %v1553_v55 = vpop.permute.xlu1 %1552  ;;  %v1613_v57 = vld [vmem:[#allocation3 + $0x10] sm:$0xff] }
 0x34c   : > { %v1263_v56 = vpop.permute.xlu0 %1262  ;;  %1598 = vst.msk [vmem:[#allocation3 + $0x18] sm:$0xff] %vm1594_vm13, %v1553_v55  ;;  %2442 = vmatprep.mubr.msk.f32.mxu0 %vm1637_vm14, %v1613_v57 }
 0x34d   : > { %1307 = vst.msk [vmem:[#allocation3 + $0x20] sm:$0xff] %vm1302_vm10, %v1263_v56  ;;  %1181 = vrot.lane.b32.xlu1 %v1427_v43, %s2584_s23 }
 0x34e   : > { %1086 = vrot.lane.b32.xlu0 %v2904_v54, %s2583_s22  ;;  %v1525_v54 = vld [vmem:[#allocation2 + $0xb2] sm:$0xff] }
 0x34f   : > { %v976_v58 = vpop.permute.xlu1 %975 }
 0x350   : > { %v881_v59 = vpop.permute.xlu0 %880  ;;  %1018 = vst.msk [vmem:[#allocation3 + $0x30] sm:$0xff] %vm1011_vm7, %v976_v58 }
 0x351   : > { %922 = vst.msk [vmem:[#allocation3 + $0x38] sm:$0xff] %vm914_vm6, %v881_v59  ;;  %1566 = vrot.lane.b32.xlu1 %v1524_v52, %s2588_s16 }
 0x352   : > { %1471 = vrot.lane.b32.xlu0 %v1428_v44, %s2587_s11 }
 0x353   : > { %v1361_v60 = vpop.permute.xlu1 %1360  ;;  %v1614_v62 = vld [vmem:[#allocation3 + $0x18] sm:$0xff] }
 0x354   : > { %v1265_v61 = vpop.permute.xlu0 %1264  ;;  %1405 = vst.msk [vmem:[#allocation3 + $0x20] sm:$0xff] %vm1400_vm11, %v1361_v60  ;;  %2443 = vmatmul.mubr.msk.f32.gmra.mxu0 %vm1637_vm14, %v1614_v62 }
 0x355   : > { %1308 = vst.msk [vmem:[#allocation3 + $0x28] sm:$0xff] %vm1302_vm10, %v1265_v61  ;;  %1183 = vrot.lane.b32.xlu1 %v1428_v44, %s2584_s23 }
 0x356   : > { %894 = vrot.lane.b32.xlu0 %v1427_v43, %s2582_s20 }
 0x357   : > { %v1073_v63 = vpop.permute.xlu1 %1072 }
 0x358   : > { %v978_v0 = vpop.permute.xlu0 %977  ;;  %1115 = vst.msk [vmem:[#allocation3 + $0x30] sm:$0xff] %vm1108_vm8, %v1073_v63 }
 0x359   : > { %1019 = vst.msk [vmem:[#allocation3 + $0x38] sm:$0xff] %vm1011_vm7, %v978_v0  ;;  %1568 = vrot.lane.b32.xlu1 %v1525_v54, %s2588_s16 }
 0x35a   : > { %1278 = vrot.lane.b32.xlu0 %v1524_v52, %s2585_s8 }
 0x35b   : > { %v1458_v1 = vpop.permute.xlu1 %1457 }
 0x35c   : > { %v1363_v2 = vpop.permute.xlu0 %1362  ;;  %1502 = vst.msk [vmem:[#allocation3 + $0x20] sm:$0xff] %vm1497_vm12, %v1458_v1 }
 0x35d   : > { %1406 = vst.msk [vmem:[#allocation3 + $0x28] sm:$0xff] %vm1400_vm11, %v1363_v2  ;;  %991 = vrot.lane.b32.xlu1 %v1524_v52, %s2581_s24 }
 0x35e   : > { %896 = vrot.lane.b32.xlu0 %v1428_v44, %s2582_s20 }
 0x35f   : > { %v1170_v4 = vpop.permute.xlu1 %1169 }
 0x360   : > { %v1075_v5 = vpop.permute.xlu0 %1074  ;;  %1212 = vst.msk [vmem:[#allocation3 + $0x30] sm:$0xff] %vm1205_vm9, %v1170_v4 }
 0x361   : > { %1116 = vst.msk [vmem:[#allocation3 + $0x38] sm:$0xff] %vm1108_vm8, %v1075_v5  ;;  %1376 = vrot.lane.b32.xlu1 %v1332_v3, %s2586_s9 }
 0x362   : > { %1280 = vrot.lane.b32.xlu0 %v1525_v54, %s2585_s8 }
 0x363   : > { %v1555_v6 = vpop.permute.xlu1 %1554 }
 0x364   : > { %v1460_v7 = vpop.permute.xlu0 %1459  ;;  %1599 = vst.msk [vmem:[#allocation3 + $0x20] sm:$0xff] %vm1594_vm13, %v1555_v6 }
 0x365   : > { %1503 = vst.msk [vmem:[#allocation3 + $0x28] sm:$0xff] %vm1497_vm12, %v1460_v7  ;;  %1088 = vrot.lane.b32.xlu1 %v1332_v3, %s2583_s22 }
 0x366   : > { %993 = vrot.lane.b32.xlu0 %v1525_v54, %s2581_s24 }
 0x367   : > { %v1172_v9 = vpop.permute.xlu1 %1171 }
 0x368   : > { %v883_v10 = vpop.permute.xlu0 %882  ;;  %1213 = vst.msk [vmem:[#allocation3 + $0x38] sm:$0xff] %vm1205_vm9, %v1172_v9 }
 0x369   : > { %923 = vst.msk [vmem:[#allocation3 + $0x40] sm:$0xff] %vm914_vm6, %v883_v10  ;;  %1473 = vrot.lane.b32.xlu1 %v3072_v47, %s2587_s11 }
 0x36a   : > { %1378 = vrot.lane.b32.xlu0 %v1333_v8, %s2586_s9 }
 0x36b   : > { %v1557_v11 = vpop.permute.xlu1 %1556  ;;  %v1615_v13 = vld [vmem:[#allocation3 + $0x20] sm:$0xff] }
 0x36c   : > { %v1267_v12 = vpop.permute.xlu0 %1266  ;;  %1600 = vst.msk [vmem:[#allocation3 + $0x28] sm:$0xff] %vm1594_vm13, %v1557_v11  ;;  %2445 = vmatprep.mubr.msk.f32.mxu0 %vm1637_vm14, %v1615_v13 }
 0x36d   : > { %1309 = vst.msk [vmem:[#allocation3 + $0x30] sm:$0xff] %vm1302_vm10, %v1267_v12  ;;  %1185 = vrot.lane.b32.xlu1 %v3072_v47, %s2584_s23 }
 0x36e   : > { %1090 = vrot.lane.b32.xlu0 %v1333_v8, %s2583_s22 }
 0x36f   : > { %v980_v15 = vpop.permute.xlu1 %979 }
 0x370   : > { %v885_v16 = vpop.permute.xlu0 %884  ;;  %1020 = vst.msk [vmem:[#allocation3 + $0x40] sm:$0xff] %vm1011_vm7, %v980_v15 }
 0x371   : > { %924 = vst.msk [vmem:[#allocation3 + $0x48] sm:$0xff] %vm914_vm6, %v885_v16  ;;  %1570 = vrot.lane.b32.xlu1 %v1526_v14, %s2588_s16 }
 0x372   : > { %1475 = vrot.lane.b32.xlu0 %v3082_v48, %s2587_s11 }
 0x373   : > { %v1365_v17 = vpop.permute.xlu1 %1364  ;;  %v1616_v19 = vld [vmem:[#allocation3 + $0x28] sm:$0xff] }
 0x374   : > { %v1269_v18 = vpop.permute.xlu0 %1268  ;;  %1407 = vst.msk [vmem:[#allocation3 + $0x30] sm:$0xff] %vm1400_vm11, %v1365_v17  ;;  %2446 = vmatmul.mubr.msk.f32.gmra.mxu0 %vm1637_vm14, %v1616_v19 }
 0x375   : > { %1310 = vst.msk [vmem:[#allocation3 + $0x38] sm:$0xff] %vm1302_vm10, %v1269_v18  ;;  %1282 = vrot.lane.b32.xlu1 %v1526_v14, %s2585_s8 }
 0x376   : > { %1187 = vrot.lane.b32.xlu0 %v3082_v48, %s2584_s23 }
 0x377   : > { %v1077_v21 = vpop.permute.xlu1 %1076 }
 0x378   : > { %v982_v22 = vpop.permute.xlu0 %981  ;;  %1117 = vst.msk [vmem:[#allocation3 + $0x40] sm:$0xff] %vm1108_vm8, %v1077_v21 }
 0x379   : > { %1021 = vst.msk [vmem:[#allocation3 + $0x48] sm:$0xff] %vm1011_vm7, %v982_v22  ;;  %1284 = vrot.lane.b32.xlu1 %v1527_v20, %s2585_s8 }
 0x37a   : > { %1572 = vrot.lane.b32.xlu0 %v1527_v20, %s2588_s16 }
 0x37b   : > { %v1462_v25 = vpop.permute.xlu1 %1461 }
 0x37c   : > { %v1367_v26 = vpop.permute.xlu0 %1366  ;;  %1504 = vst.msk [vmem:[#allocation3 + $0x30] sm:$0xff] %vm1497_vm12, %v1462_v25  ;;  %v3222_v25 = vld [vmem:[%s3374_s4] ss:$0 sm:$0xff] }
 0x37d   : > { %1408 = vst.msk [vmem:[#allocation3 + $0x38] sm:$0xff] %vm1400_vm11, %v1367_v26  ;;  %1382 = vrot.lane.b32.xlu1 %v1335_v24, %s2586_s9 }
 0x37e   : > { %1380 = vrot.lane.b32.xlu0 %v1334_v23, %s2586_s9 }
 0x37f   : > { %v1174_v29 = vpop.permute.xlu1 %1173 }
 0x380   : > { %v1079_v30 = vpop.permute.xlu0 %1078  ;;  %1214 = vst.msk [vmem:[#allocation3 + $0x40] sm:$0xff] %vm1205_vm9, %v1174_v29 }
 0x381   : > { %1118 = vst.msk [vmem:[#allocation3 + $0x48] sm:$0xff] %vm1108_vm8, %v1079_v30  ;;  %1479 = vrot.lane.b32.xlu1 %v1432_v28, %s2587_s11  ;;  %v2467_v28 = vpop.f32.mrf.mxu1 }
 0x382   : > { %1477 = vrot.lane.b32.xlu0 %v1431_v27, %s2587_s11  ;;  %v1966_v29 = vadd.f32 %v2467_v28, %v3222_v25 }
 0x383   : > { %v1559_v33 = vpop.permute.xlu1 %1558  ;;  %v1960_v30 = vpop.f32.mrf.mxu1 }
 0x384   : > { %v1464_v34 = vpop.permute.xlu0 %1463  ;;  %1601 = vst.msk [vmem:[#allocation3 + $0x30] sm:$0xff] %vm1594_vm13, %v1559_v33 }
 0x385   : > { %1505 = vst.msk [vmem:[#allocation3 + $0x38] sm:$0xff] %vm1497_vm12, %v1464_v34  ;;  %1576 = vrot.lane.b32.xlu1 %v1529_v32, %s2588_s16  ;;  %v2040_v34 = vmax.f32 %v1966_v29, 0.0 }
 0x386   : > { %1574 = vrot.lane.b32.xlu0 %v1528_v31, %s2588_s16 }
 0x387   : > { %v1176_v35 = vpop.permute.xlu1 %1175  ;;  %2056 = vst.msk [vmem:[%s2720_s25 + $0x8] sm:$0xff] %vm361_vm4, %v2040_v34 }
 0x388   : > { %v887_v36 = vpop.permute.xlu0 %886  ;;  %1215 = vst.msk [vmem:[#allocation3 + $0x48] sm:$0xff] %vm1205_vm9, %v1176_v35  ;;  %v1961_v35 = vadd.f32 %v3222_v25, %v1960_v30 }
 0x389   : > { %925 = vst.msk [vmem:[#allocation3 + $0x50] sm:$0xff] %vm914_vm6, %v887_v36 }
 0x38a   : > { %v2039_v36 = vmax.f32 %v1961_v35, 0.0 }
 0x38b   : > { %v1561_v37 = vpop.permute.xlu1 %1560  ;;  %v1617_v39 = vld [vmem:[#allocation3 + $0x30] sm:$0xff] }
 0x38c   : > { %v1271_v38 = vpop.permute.xlu0 %1270  ;;  %1602 = vst.msk [vmem:[#allocation3 + $0x38] sm:$0xff] %vm1594_vm13, %v1561_v37  ;;  %2448 = vmatprep.mubr.msk.f32.mxu0 %vm1637_vm14, %v1617_v39  ;;  %v3240_v39 = vld [vmem:[%s3376_s6] ss:$0 sm:$0xff] }
 0x38d   : > { %1311 = vst.msk [vmem:[#allocation3 + $0x40] sm:$0xff] %vm1302_vm10, %v1271_v38 }
 0x38e   : > { %2055 = vst.msk [vmem:[%s2720_s25] sm:$0xff] %vm361_vm4, %v2039_v36 }
 0x38f   : > { %v984_v40 = vpop.permute.xlu1 %983 }
 0x390   : > { %v889_v41 = vpop.permute.xlu0 %888  ;;  %1022 = vst.msk [vmem:[#allocation3 + $0x50] sm:$0xff] %vm1011_vm7, %v984_v40 }
 0x391   : > { %926 = vst.msk [vmem:[#allocation3 + $0x58] sm:$0xff] %vm914_vm6, %v889_v41 }
 0x393   : > { %v1369_v42 = vpop.permute.xlu1 %1368  ;;  %v1618_v44 = vld [vmem:[#allocation3 + $0x38] sm:$0xff] }
 0x394   : > { %v1273_v43 = vpop.permute.xlu0 %1272  ;;  %1409 = vst.msk [vmem:[#allocation3 + $0x40] sm:$0xff] %vm1400_vm11, %v1369_v42  ;;  %2449 = vmatmul.mubr.msk.f32.gmra.mxu0 %vm1637_vm14, %v1618_v44 }
 0x395   : > { %1312 = vst.msk [vmem:[#allocation3 + $0x48] sm:$0xff] %vm1302_vm10, %v1273_v43 }
 0x397   : > { %v1081_v45 = vpop.permute.xlu1 %1080 }
 0x398   : > { %v986_v46 = vpop.permute.xlu0 %985  ;;  %1119 = vst.msk [vmem:[#allocation3 + $0x50] sm:$0xff] %vm1108_vm8, %v1081_v45 }
 0x399   : > { %1023 = vst.msk [vmem:[#allocation3 + $0x58] sm:$0xff] %vm1011_vm7, %v986_v46 }
 0x39b   : > { %v1466_v47 = vpop.permute.xlu1 %1465 }
 0x39c   : > { %v1371_v48 = vpop.permute.xlu0 %1370  ;;  %1506 = vst.msk [vmem:[#allocation3 + $0x40] sm:$0xff] %vm1497_vm12, %v1466_v47 }
 0x39d   : > { %1410 = vst.msk [vmem:[#allocation3 + $0x48] sm:$0xff] %vm1400_vm11, %v1371_v48 }
 0x39f   : > { %v1178_v49 = vpop.permute.xlu1 %1177 }
 0x3a0   : > { %v1083_v50 = vpop.permute.xlu0 %1082  ;;  %1216 = vst.msk [vmem:[#allocation3 + $0x50] sm:$0xff] %vm1205_vm9, %v1178_v49 }
 0x3a1   : > { %1120 = vst.msk [vmem:[#allocation3 + $0x58] sm:$0xff] %vm1108_vm8, %v1083_v50 }
 0x3a3   : > { %v1563_v51 = vpop.permute.xlu1 %1562 }
 0x3a4   : > { %v1468_v53 = vpop.permute.xlu0 %1467  ;;  %1603 = vst.msk [vmem:[#allocation3 + $0x40] sm:$0xff] %vm1594_vm13, %v1563_v51  ;;  %v2470_v51 = vpop.f32.mrf.mxu1 }
 0x3a5   : > { %1507 = vst.msk [vmem:[#allocation3 + $0x48] sm:$0xff] %vm1497_vm12, %v1468_v53  ;;  %v1976_v53 = vadd.f32 %v2470_v51, %v3222_v25 }
 0x3a7   : > { %v1180_v55 = vpop.permute.xlu1 %1179 }
 0x3a8   : > { %v891_v56 = vpop.permute.xlu0 %890  ;;  %1217 = vst.msk [vmem:[#allocation3 + $0x58] sm:$0xff] %vm1205_vm9, %v1180_v55  ;;  %v1970_v55 = vpop.f32.mrf.mxu1 }
 0x3a9   : > { %927 = vst.msk [vmem:[#allocation3 + $0x60] sm:$0xff] %vm914_vm6, %v891_v56  ;;  %v2042_v56 = vmax.f32 %v1976_v53, 0.0 }
 0x3ab   : > { %v1565_v57 = vpop.permute.xlu1 %1564  ;;  %v1619_v58 = vld [vmem:[#allocation3 + $0x40] sm:$0xff]  ;;  %2058 = vst.msk [vmem:[%s2720_s25 + $0x18] sm:$0xff] %vm361_vm4, %v2042_v56 }
 0x3ac   : > { %v1275_v52 = vpop.permute.xlu0 %1274  ;;  %1604 = vst.msk [vmem:[#allocation3 + $0x48] sm:$0xff] %vm1594_vm13, %v1565_v57  ;;  %2451 = vmatprep.mubr.msk.f32.mxu0 %vm1637_vm14, %v1619_v58  ;;  %v1971_v57 = vadd.f32 %v3222_v25, %v1970_v55 }
 0x3ad   : > { %1313 = vst.msk [vmem:[#allocation3 + $0x50] sm:$0xff] %vm1302_vm10, %v1275_v52 }
 0x3af   : > { %v988_v59 = vpop.permute.xlu1 %987 }
 0x3b0   : > { %v893_v60 = vpop.permute.xlu0 %892  ;;  %1024 = vst.msk [vmem:[#allocation3 + $0x60] sm:$0xff] %vm1011_vm7, %v988_v59  ;;  %v2041_v59 = vmax.f32 %v1971_v57, 0.0 }
 0x3b1   : > { %928 = vst.msk [vmem:[#allocation3 + $0x68] sm:$0xff] %vm914_vm6, %v893_v60 }
 0x3b2   : > { %2057 = vst.msk [vmem:[%s2720_s25 + $0x10] sm:$0xff] %vm361_vm4, %v2041_v59 }
 0x3b3   : > { %v1373_v61 = vpop.permute.xlu1 %1372  ;;  %v1620_v54 = vld [vmem:[#allocation3 + $0x48] sm:$0xff] }
 0x3b4   : > { %v1277_v62 = vpop.permute.xlu0 %1276  ;;  %1411 = vst.msk [vmem:[#allocation3 + $0x50] sm:$0xff] %vm1400_vm11, %v1373_v61  ;;  %2452 = vmatmul.mubr.msk.f32.gmra.mxu0 %vm1637_vm14, %v1620_v54 }
 0x3b5   : > { %1314 = vst.msk [vmem:[#allocation3 + $0x58] sm:$0xff] %vm1302_vm10, %v1277_v62 }
 0x3b7   : > { %v1085_v63 = vpop.permute.xlu1 %1084 }
 0x3b8   : > { %v990_v0 = vpop.permute.xlu0 %989  ;;  %1121 = vst.msk [vmem:[#allocation3 + $0x60] sm:$0xff] %vm1108_vm8, %v1085_v63 }
 0x3b9   : > { %1025 = vst.msk [vmem:[#allocation3 + $0x68] sm:$0xff] %vm1011_vm7, %v990_v0 }
 0x3bb   : > { %v1470_v1 = vpop.permute.xlu1 %1469 }
 0x3bc   : > { %v1375_v2 = vpop.permute.xlu0 %1374  ;;  %1508 = vst.msk [vmem:[#allocation3 + $0x50] sm:$0xff] %vm1497_vm12, %v1470_v1  ;;  %v2473_v1 = vpop.f32.mrf.mxu1 }
 0x3bd   : > { %1412 = vst.msk [vmem:[#allocation3 + $0x58] sm:$0xff] %vm1400_vm11, %v1375_v2  ;;  %v1986_v2 = vadd.f32 %v2473_v1, %v3222_v25 }
 0x3bf   : > { %v1182_v3 = vpop.permute.xlu1 %1181 }
 0x3c0   : > { %v1087_v4 = vpop.permute.xlu0 %1086  ;;  %1218 = vst.msk [vmem:[#allocation3 + $0x60] sm:$0xff] %vm1205_vm9, %v1182_v3  ;;  %v1980_v3 = vpop.f32.mrf.mxu1 }
 0x3c1   : > { %1122 = vst.msk [vmem:[#allocation3 + $0x68] sm:$0xff] %vm1108_vm8, %v1087_v4  ;;  %v2044_v4 = vmax.f32 %v1986_v2, 0.0 }
 0x3c3   : > { %v1567_v5 = vpop.permute.xlu1 %1566  ;;  %2060 = vst.msk [vmem:[%s2720_s25 + $0x28] sm:$0xff] %vm361_vm4, %v2044_v4 }
 0x3c4   : > { %v1472_v6 = vpop.permute.xlu0 %1471  ;;  %1605 = vst.msk [vmem:[#allocation3 + $0x50] sm:$0xff] %vm1594_vm13, %v1567_v5  ;;  %v1981_v5 = vadd.f32 %v3222_v25, %v1980_v3 }
 0x3c5   : > { %1509 = vst.msk [vmem:[#allocation3 + $0x58] sm:$0xff] %vm1497_vm12, %v1472_v6 }
 0x3c6   : > { %v2043_v6 = vmax.f32 %v1981_v5, 0.0 }
 0x3c7   : > { %v1184_v7 = vpop.permute.xlu1 %1183 }
 0x3c8   : > { %v895_v8 = vpop.permute.xlu0 %894  ;;  %1219 = vst.msk [vmem:[#allocation3 + $0x68] sm:$0xff] %vm1205_vm9, %v1184_v7 }
 0x3c9   : > { %929 = vst.msk [vmem:[#allocation3 + $0x70] sm:$0xff] %vm914_vm6, %v895_v8 }
 0x3ca   : > { %2059 = vst.msk [vmem:[%s2720_s25 + $0x20] sm:$0xff] %vm361_vm4, %v2043_v6 }
 0x3cb   : > { %v1569_v9 = vpop.permute.xlu1 %1568  ;;  %v1621_v11 = vld [vmem:[#allocation3 + $0x50] sm:$0xff] }
 0x3cc   : > { %v1279_v10 = vpop.permute.xlu0 %1278  ;;  %1606 = vst.msk [vmem:[#allocation3 + $0x58] sm:$0xff] %vm1594_vm13, %v1569_v9  ;;  %2454 = vmatprep.mubr.msk.f32.mxu0 %vm1637_vm14, %v1621_v11 }
 0x3cd   : > { %1315 = vst.msk [vmem:[#allocation3 + $0x60] sm:$0xff] %vm1302_vm10, %v1279_v10 }
 0x3cf   : > { %v992_v13 = vpop.permute.xlu1 %991 }
 0x3d0   : > { %v897_v12 = vpop.permute.xlu0 %896  ;;  %1026 = vst.msk [vmem:[#allocation3 + $0x70] sm:$0xff] %vm1011_vm7, %v992_v13  ;;  %v2476_v13 = vpop.f32.mrf.mxu1 }
 0x3d1   : > { %930 = vst.msk [vmem:[#allocation3 + $0x78] sm:$0xff] %vm914_vm6, %v897_v12 }
 0x3d3   : > { %v1377_v15 = vpop.permute.xlu1 %1376  ;;  %v1622_v16 = vld [vmem:[#allocation3 + $0x58] sm:$0xff] }
 0x3d4   : > { %v1281_v14 = vpop.permute.xlu0 %1280  ;;  %1413 = vst.msk [vmem:[#allocation3 + $0x60] sm:$0xff] %vm1400_vm11, %v1377_v15  ;;  %2455 = vmatmul.mubr.msk.f32.gmra.mxu0 %vm1637_vm14, %v1622_v16  ;;  %v1990_v15 = vpop.f32.mrf.mxu1 }
 0x3d5   : > { %1316 = vst.msk [vmem:[#allocation3 + $0x68] sm:$0xff] %vm1302_vm10, %v1281_v14  ;;  %v1996_v14 = vadd.f32 %v2476_v13, %v3222_v25 }
 0x3d7   : > { %v1089_v18 = vpop.permute.xlu1 %1088  ;;  %v2046_v16 = vmax.f32 %v1996_v14, 0.0 }
 0x3d8   : > { %v994_v17 = vpop.permute.xlu0 %993  ;;  %1123 = vst.msk [vmem:[#allocation3 + $0x70] sm:$0xff] %vm1108_vm8, %v1089_v18 }
 0x3d9   : > { %1027 = vst.msk [vmem:[#allocation3 + $0x78] sm:$0xff] %vm1011_vm7, %v994_v17  ;;  %v1991_v17 = vadd.f32 %v3222_v25, %v1990_v15 }
 0x3da   : > { %2062 = vst.msk [vmem:[%s2720_s25 + $0x38] sm:$0xff] %vm361_vm4, %v2046_v16 }
 0x3db   : > { %v1474_v20 = vpop.permute.xlu1 %1473  ;;  %v2045_v18 = vmax.f32 %v1991_v17, 0.0 }
 0x3dc   : > { %v1379_v19 = vpop.permute.xlu0 %1378  ;;  %1510 = vst.msk [vmem:[#allocation3 + $0x60] sm:$0xff] %vm1497_vm12, %v1474_v20 }
 0x3dd   : > { %1414 = vst.msk [vmem:[#allocation3 + $0x68] sm:$0xff] %vm1400_vm11, %v1379_v19  ;;  %v2479_v19 = vpop.f32.mrf.mxu1 }
 0x3de   : > { %2061 = vst.msk [vmem:[%s2720_s25 + $0x30] sm:$0xff] %vm361_vm4, %v2045_v18  ;;  %v2006_v20 = vadd.f32 %v2479_v19, %v3222_v25 }
 0x3df   : > { %v1186_v22 = vpop.permute.xlu1 %1185 }
 0x3e0   : > { %v1091_v21 = vpop.permute.xlu0 %1090  ;;  %1220 = vst.msk [vmem:[#allocation3 + $0x70] sm:$0xff] %vm1205_vm9, %v1186_v22  ;;  %v2048_v22 = vmax.f32 %v2006_v20, 0.0 }
 0x3e1   : > { %1124 = vst.msk [vmem:[#allocation3 + $0x78] sm:$0xff] %vm1108_vm8, %v1091_v21  ;;  %v2000_v21 = vpop.f32.mrf.mxu1 }
 0x3e2   : > { %2064 = vst.msk [vmem:[%s2720_s25 + $0x48] sm:$0xff] %vm361_vm4, %v2048_v22 }
 0x3e3   : > { %v1571_v24 = vpop.permute.xlu1 %1570  ;;  %v2482_v34 = vpop.f32.mrf.mxu1 }
 0x3e4   : > { %v1476_v23 = vpop.permute.xlu0 %1475  ;;  %1607 = vst.msk [vmem:[#allocation3 + $0x60] sm:$0xff] %vm1594_vm13, %v1571_v24  ;;  %v2016_v35 = vadd.f32 %v2482_v34, %v3222_v25 }
 0x3e5   : > { %1511 = vst.msk [vmem:[#allocation3 + $0x68] sm:$0xff] %vm1497_vm12, %v1476_v23  ;;  %v2001_v23 = vadd.f32 %v3222_v25, %v2000_v21  ;;  %v2010_v36 = vpop.f32.mrf.mxu1 }
 0x3e7   : > { %v1283_v27 = vpop.permute.xlu1 %1282  ;;  %v2047_v24 = vmax.f32 %v2001_v23, 0.0 }
 0x3e8   : > { %v1188_v26 = vpop.permute.xlu0 %1187  ;;  %1317 = vst.msk [vmem:[#allocation3 + $0x70] sm:$0xff] %vm1302_vm10, %v1283_v27 }
 0x3e9   : > { %1221 = vst.msk [vmem:[#allocation3 + $0x78] sm:$0xff] %vm1205_vm9, %v1188_v26 }
 0x3ea   : > { %2063 = vst.msk [vmem:[%s2720_s25 + $0x40] sm:$0xff] %vm361_vm4, %v2047_v24 }
 0x3eb   : > { %v1285_v32 = vpop.permute.xlu1 %1284  ;;  %v1623_v33 = vld [vmem:[#allocation3 + $0x60] sm:$0xff] }
 0x3ec   : > { %v1573_v31 = vpop.permute.xlu0 %1572  ;;  %1318 = vst.msk [vmem:[#allocation3 + $0x78] sm:$0xff] %vm1302_vm10, %v1285_v32  ;;  %2457 = vmatprep.mubr.msk.f32.mxu0 %vm1637_vm14, %v1623_v33 }
 0x3ed   : > { %1608 = vst.msk [vmem:[#allocation3 + $0x68] sm:$0xff] %vm1594_vm13, %v1573_v31 }
 0x3ef   : > { %v1383_v38 = vpop.permute.xlu1 %1382 }
 0x3f0   : > { %v1381_v37 = vpop.permute.xlu0 %1380  ;;  %1416 = vst.msk [vmem:[#allocation3 + $0x78] sm:$0xff] %vm1400_vm11, %v1383_v38  ;;  %v2011_v38 = vadd.f32 %v3222_v25, %v2010_v36 }
 0x3f1   : > { %1415 = vst.msk [vmem:[#allocation3 + $0x70] sm:$0xff] %vm1400_vm11, %v1381_v37  ;;  %v2050_v37 = vmax.f32 %v2016_v35, 0.0 }
 0x3f3   : > { %v1480_v41 = vpop.permute.xlu1 %1479  ;;  %2066 = vst.msk [vmem:[%s2720_s25 + $0x58] sm:$0xff] %vm361_vm4, %v2050_v37 }
 0x3f4   : > { %v1478_v40 = vpop.permute.xlu0 %1477  ;;  %v1624_v42 = vld [vmem:[#allocation3 + $0x68] sm:$0xff]  ;;  %1513 = vst.msk [vmem:[#allocation3 + $0x78] sm:$0xff] %vm1497_vm12, %v1480_v41  ;;  %v2441_v43 = vpop.f32.mrf.mxu0 }
 0x3f5   : > { %1512 = vst.msk [vmem:[#allocation3 + $0x70] sm:$0xff] %vm1497_vm12, %v1478_v40  ;;  %2458 = vmatmul.mubr.msk.f32.gmra.mxu0 %vm1637_vm14, %v1624_v42  ;;  %v1762_v44 = vadd.f32 %v2441_v43, %v3240_v39  ;;  %v2049_v40 = vmax.f32 %v2011_v38, 0.0 }
 0x3f6   : > { %v1756_v45 = vpop.f32.mrf.mxu0 }
 0x3f7   : > { %v1836_v46 = vmax.f32 %v1762_v44, 0.0  ;;  %v1757_v47 = vadd.f32 %v3240_v39, %v1756_v45  ;;  %v1577_v49 = vpop.permute.xlu1 %1576  ;;  %2065 = vst.msk [vmem:[%s2720_s25 + $0x50] sm:$0xff] %vm361_vm4, %v2049_v40 }
 0x3f8   : > { %v1575_v48 = vpop.permute.xlu0 %1574  ;;  %1610 = vst.msk [vmem:[#allocation3 + $0x78] sm:$0xff] %vm1594_vm13, %v1577_v49  ;;  %v2485_v49 = vpop.f32.mrf.mxu1 }
 0x3f9   : > { %1609 = vst.msk [vmem:[#allocation3 + $0x70] sm:$0xff] %vm1594_vm13, %v1575_v48  ;;  %v1835_v50 = vmax.f32 %v1757_v47, 0.0  ;;  %2089 = vrot.lane.b32.xlu1 %v1836_v46, %s2581_s24 }
 0x3fa   : > { %v2020_v51 = vpop.f32.mrf.mxu1 }
 0x3fb   : > { %2087 = vrot.lane.b32.xlu0 %v1835_v50, %s2581_s24  ;;  %v2026_v50 = vadd.f32 %v2485_v49, %v3222_v25  ;;  %v2021_v55 = vadd.f32 %v3222_v25, %v2020_v51 }
 0x3fd   : > { %v2052_v53 = vmax.f32 %v2026_v50, 0.0  ;;  %v2051_v56 = vmax.f32 %v2021_v55, 0.0 }
 0x3ff   : > { %v1626_v58 = vld [vmem:[#allocation3 + $0x78] sm:$0xff]  ;;  %2068 = vst.msk [vmem:[%s2720_s25 + $0x68] sm:$0xff] %vm361_vm4, %v2052_v53  ;;  %2067 = vst.msk [vmem:[%s2720_s25 + $0x60] sm:$0xff] %vm361_vm4, %v2051_v56 }
 0x400   : > { %v1625_v52 = vld [vmem:[#allocation3 + $0x70] sm:$0xff] }
 0x401   : > { %2460 = vmatprep.mubr.msk.f32.mxu0 %vm1637_vm14, %v1625_v52 }
 0x402   : > { %2461 = vmatmul.mubr.msk.f32.gmra.mxu0 %vm1637_vm14, %v1626_v58 }
 0x414   : > { %v2444_v60 = vpop.f32.mrf.mxu0 }
 0x415   : > { %v1772_v61 = vadd.f32 %v2444_v60, %v3240_v39 }
 0x416   : > { %v1766_v62 = vpop.f32.mrf.mxu0 }
 0x417   : > { %v1838_v54 = vmax.f32 %v1772_v61, 0.0  ;;  %v1767_v63 = vadd.f32 %v3240_v39, %v1766_v62 }
 0x419   : > { %v1837_v0 = vmax.f32 %v1767_v63, 0.0  ;;  %2093 = vrot.lane.b32.xlu1 %v1838_v54, %s2581_s24  ;;  %v2488_v63 = vpop.f32.mrf.mxu1 }
 0x41b   : > { %2091 = vrot.lane.b32.xlu0 %v1837_v0, %s2581_s24  ;;  %v2036_v0 = vadd.f32 %v2488_v63, %v3222_v25  ;;  %v2030_v1 = vpop.f32.mrf.mxu1 }
 0x41c   : > { %v2031_v3 = vadd.f32 %v3222_v25, %v2030_v1 }
 0x41d   : > { %v2054_v2 = vmax.f32 %v2036_v0, 0.0 }
 0x41e   : > { %v2053_v4 = vmax.f32 %v2031_v3, 0.0 }
 0x41f   : > { %2070 = vst.msk [vmem:[%s2720_s25 + $0x78] sm:$0xff] %vm361_vm4, %v2054_v2 }
 0x420   : > { %2069 = vst.msk [vmem:[%s2720_s25 + $0x70] sm:$0xff] %vm361_vm4, %v2053_v4 }
 0x434   : > { %v2447_v7 = vpop.f32.mrf.mxu0 }
 0x435   : > { %v1782_v8 = vadd.f32 %v2447_v7, %v3240_v39 }
 0x436   : > { %v1776_v9 = vpop.f32.mrf.mxu0 }
 0x437   : > { %v1840_v10 = vmax.f32 %v1782_v8, 0.0  ;;  %v1777_v11 = vadd.f32 %v3240_v39, %v1776_v9 }
 0x439   : > { %v1839_v12 = vmax.f32 %v1777_v11, 0.0  ;;  %2097 = vrot.lane.b32.xlu1 %v1840_v10, %s2581_s24 }
 0x43b   : > { %2095 = vrot.lane.b32.xlu0 %v1839_v12, %s2581_s24 }
 0x454   : > { %v2450_v26 = vpop.f32.mrf.mxu0 }
 0x455   : > { %v1792_v27 = vadd.f32 %v2450_v26, %v3240_v39 }
 0x456   : > { %v1786_v28 = vpop.f32.mrf.mxu0 }
 0x457   : > { %v1842_v29 = vmax.f32 %v1792_v27, 0.0  ;;  %v1787_v30 = vadd.f32 %v3240_v39, %v1786_v28 }
 0x459   : > { %v1841_v31 = vmax.f32 %v1787_v30, 0.0  ;;  %2101 = vrot.lane.b32.xlu1 %v1842_v29, %s2581_s24 }
 0x45b   : > { %2099 = vrot.lane.b32.xlu0 %v1841_v31, %s2581_s24 }
 0x46b   : > { %v2090_v32 = vpop.permute.xlu1 %2089 }
 0x46c   : > { %2137 = vst.msk [vmem:[%s2720_s25 + $0x8] sm:$0xff] %vm2135_vm15, %v2090_v32 }
 0x46d   : > { %v2088_v33 = vpop.permute.xlu0 %2087 }
 0x46e   : > { %2136 = vst.msk [vmem:[%s2720_s25] sm:$0xff] %vm2135_vm15, %v2088_v33 }
 0x474   : > { %v2453_v41 = vpop.f32.mrf.mxu0 }
 0x475   : > { %v1802_v42 = vadd.f32 %v2453_v41, %v3240_v39 }
 0x476   : > { %v1796_v43 = vpop.f32.mrf.mxu0 }
 0x477   : > { %v1844_v44 = vmax.f32 %v1802_v42, 0.0  ;;  %v1797_v45 = vadd.f32 %v3240_v39, %v1796_v43 }
 0x479   : > { %v1843_v46 = vmax.f32 %v1797_v45, 0.0  ;;  %2105 = vrot.lane.b32.xlu1 %v1844_v44, %s2581_s24 }
 0x47b   : > { %2103 = vrot.lane.b32.xlu0 %v1843_v46, %s2581_s24 }
 0x48b   : > { %v2094_v47 = vpop.permute.xlu1 %2093 }
 0x48c   : > { %2139 = vst.msk [vmem:[%s2720_s25 + $0x18] sm:$0xff] %vm2135_vm15, %v2094_v47 }
 0x48d   : > { %v2092_v48 = vpop.permute.xlu0 %2091 }
 0x48e   : > { %2138 = vst.msk [vmem:[%s2720_s25 + $0x10] sm:$0xff] %vm2135_vm15, %v2092_v48 }
 0x494   : > { %v2456_v57 = vpop.f32.mrf.mxu0 }
 0x495   : > { %v1812_v52 = vadd.f32 %v2456_v57, %v3240_v39 }
 0x496   : > { %v1806_v58 = vpop.f32.mrf.mxu0 }
 0x497   : > { %v1846_v59 = vmax.f32 %v1812_v52, 0.0  ;;  %v1807_v60 = vadd.f32 %v3240_v39, %v1806_v58 }
 0x499   : > { %v1845_v61 = vmax.f32 %v1807_v60, 0.0  ;;  %2109 = vrot.lane.b32.xlu1 %v1846_v59, %s2581_s24 }
 0x49b   : > { %2107 = vrot.lane.b32.xlu0 %v1845_v61, %s2581_s24 }
 0x4ab   : > { %v2098_v62 = vpop.permute.xlu1 %2097 }
 0x4ac   : > { %2141 = vst.msk [vmem:[%s2720_s25 + $0x28] sm:$0xff] %vm2135_vm15, %v2098_v62 }
 0x4ad   : > { %v2096_v54 = vpop.permute.xlu0 %2095 }
 0x4ae   : > { %2140 = vst.msk [vmem:[%s2720_s25 + $0x20] sm:$0xff] %vm2135_vm15, %v2096_v54 }
 0x4b5   : > { %v2459_v5 = vpop.f32.mrf.mxu0 }
 0x4b6   : > { %v1822_v6 = vadd.f32 %v2459_v5, %v3240_v39 }
 0x4b7   : > { %v1816_v7 = vpop.f32.mrf.mxu0 }
 0x4b8   : > { %v1848_v8 = vmax.f32 %v1822_v6, 0.0  ;;  %v1817_v9 = vadd.f32 %v3240_v39, %v1816_v7 }
 0x4ba   : > { %v1847_v10 = vmax.f32 %v1817_v9, 0.0  ;;  %2113 = vrot.lane.b32.xlu1 %v1848_v8, %s2581_s24 }
 0x4bc   : > { %2111 = vrot.lane.b32.xlu0 %v1847_v10, %s2581_s24 }
 0x4c2   : > { %v2462_v25 = vpop.f32.mrf.mxu0 }
 0x4c3   : > { %v1832_v11 = vadd.f32 %v2462_v25, %v3240_v39 }
 0x4c4   : > { %v1826_v12 = vpop.f32.mrf.mxu0 }
 0x4c5   : > { %v1850_v13 = vmax.f32 %v1832_v11, 0.0  ;;  %v1827_v14 = vadd.f32 %v3240_v39, %v1826_v12 }
 0x4c7   : > { %v1849_v15 = vmax.f32 %v1827_v14, 0.0  ;;  %2117 = vrot.lane.b32.xlu1 %v1850_v13, %s2581_s24 }
 0x4c9   : > { %2115 = vrot.lane.b32.xlu0 %v1849_v15, %s2581_s24 }
 0x4cb   : > { %v2102_v16 = vpop.permute.xlu1 %2101 }
 0x4cc   : > { %2143 = vst.msk [vmem:[%s2720_s25 + $0x38] sm:$0xff] %vm2135_vm15, %v2102_v16 }
 0x4cd   : > { %v2100_v17 = vpop.permute.xlu0 %2099 }
 0x4ce   : > { %2142 = vst.msk [vmem:[%s2720_s25 + $0x30] sm:$0xff] %vm2135_vm15, %v2100_v17 }
 0x4eb   : > { %v2106_v18 = vpop.permute.xlu1 %2105 }
 0x4ec   : > { %2145 = vst.msk [vmem:[%s2720_s25 + $0x48] sm:$0xff] %vm2135_vm15, %v2106_v18 }
 0x4ed   : > { %v2104_v19 = vpop.permute.xlu0 %2103 }
 0x4ee   : > { %2144 = vst.msk [vmem:[%s2720_s25 + $0x40] sm:$0xff] %vm2135_vm15, %v2104_v19 }
 0x50b   : > { %v2110_v39 = vpop.permute.xlu1 %2109 }
 0x50c   : > { %2147 = vst.msk [vmem:[%s2720_s25 + $0x58] sm:$0xff] %vm2135_vm15, %v2110_v39 }
 0x50d   : > { %v2108_v20 = vpop.permute.xlu0 %2107 }
 0x50e   : > { %2146 = vst.msk [vmem:[%s2720_s25 + $0x50] sm:$0xff] %vm2135_vm15, %v2108_v20 }
 0x52c   : > { %v2114_v21 = vpop.permute.xlu1 %2113 }
 0x52d   : > { %2149 = vst.msk [vmem:[%s2720_s25 + $0x68] sm:$0xff] %vm2135_vm15, %v2114_v21 }
 0x52e   : > { %v2112_v22 = vpop.permute.xlu0 %2111 }
 0x52f   : > { %2148 = vst.msk [vmem:[%s2720_s25 + $0x60] sm:$0xff] %vm2135_vm15, %v2112_v22 }
 0x539   : > { %v2118_v23 = vpop.permute.xlu1 %2117 }
 0x53a   : > { %2151 = vst.msk [vmem:[%s2720_s25 + $0x78] sm:$0xff] %vm2135_vm15, %v2118_v23 }
 0x53b   : > { %v2116_v24 = vpop.permute.xlu0 %2115 }
 0x53c   : > { %2150 = vst.msk [vmem:[%s2720_s25 + $0x70] sm:$0xff] %vm2135_vm15, %v2116_v24 }
 0x53d PF: > { %s17_s28 = sadd.s32 1, %s2578_s28   ;;  %s3378_s24 = smov %s2570_s26 }
 0x53e   : > { %p14_p9 = scmp.ge.s32.totalorder %s17_s28, 6   ;;  %s3379_s25 = smov %s2574_s27 }
 0x53f   : > { %s3380_s26 = smov %s3383_s29  ;;  %s3381_s27 = smov %s3387_s30 }
 0x540   :  { %16 = sbr.rel (!%p14_p9) target bundleno = 3 (0x3), region = 92 }

</bundles_post_ra>
